<compile_context>
chip_gen: v7x
topology: tpu7x:2x2x1
jax: 0.10.0
libtpu: 0.0.40
codegen_flags: <defaults>
</compile_context>

<pallas_src>
import functools

import jax
import jax.numpy as jnp
from jax import lax
from jax.experimental import pallas as pl
from jax.experimental.pallas import tpu as pltpu


# ----------------------------------------------------------------------------- kernel ---
def _up_kernel(x1_ref, x2_ref, mt_ref, w1a_ref, w1b_ref, sc1_ref, bi1_ref,
               w2_ref, sc2_ref, bi2_ref, mask_ref, o_ref, s1_ref, s2_ref,
               *, H, W, P):
    """One batch element: upsample(x1) -> [conv3x3+BN+ReLU] x2 over concat([x2, up(x1)])."""
    HW = H * W
    f32 = jnp.float32
    cout = w2_ref.shape[1]
    cmid = w2_ref.shape[2]

    # (1) bilinear 2x upsample (align_corners=True) as a single MXU matmul on flat spatial.
    x1u = jnp.dot(x1_ref[0], mt_ref[...], preferred_element_type=f32)        # (C1, HW)

    # (2) place upsampled x1 into a zero-padded flattened plane; interior starts at the
    #     lane-aligned offset P so the store is an unmasked, lane-dense vst.
    s1_ref[...] = jnp.zeros_like(s1_ref)
    s1_ref[:, P:P + HW] = x1u

    x2v = x2_ref[0]           # (C2, L) zero-padded flattened skip connection (from wrapper)
    x1v = s1_ref[...]         # (C1, L)
    masks = mask_ref[...]     # (3, HW): column masks for kx = 0 / 1 / 2 (zeros padding)

    # (3) conv1 (3x3, pad=1) over concat([x2, up(x1)]) as 9 shifted matmuls, + BN + ReLU.
    acc1 = jnp.zeros((cmid, HW), f32)
    for t in range(9):                                   # fully static unroll
        ky, kx = divmod(t, 3)
        off = P + (ky - 1) * W + (kx - 1)
        p2 = x2v[:, off:off + HW]
        p1 = x1v[:, off:off + HW]
        if kx != 1:                                      # zero columns that crossed a row edge
            m = masks[kx:kx + 1, :]
            p2 = p2 * m
            p1 = p1 * m
        acc1 = acc1 + jnp.dot(w1a_ref[t], p2, preferred_element_type=f32)
        acc1 = acc1 + jnp.dot(w1b_ref[t], p1, preferred_element_type=f32)
    h = jnp.maximum(acc1 * sc1_ref[...] + bi1_ref[...], 0.0)                 # (Cmid, HW)

    # (4) conv2 (3x3, pad=1) + BN + ReLU.
    s2_ref[...] = jnp.zeros_like(s2_ref)
    s2_ref[:, P:P + HW] = h
    hv = s2_ref[...]
    acc2 = jnp.zeros((cout, HW), f32)
    for t in range(9):
        ky, kx = divmod(t, 3)
        off = P + (ky - 1) * W + (kx - 1)
        p = hv[:, off:off + HW]
        if kx != 1:
            p = p * masks[kx:kx + 1, :]
        acc2 = acc2 + jnp.dot(w2_ref[t], p, preferred_element_type=f32)
    o_ref[0] = jnp.maximum(acc2 * sc2_ref[...] + bi2_ref[...], 0.0)          # lane-dense store


# ---------------------------------------------------------------------------- wrapper ---
def _interp_matrix(out_size, in_size):
    """1-D linear-interp matrix matching nn.Upsample(mode='bilinear', align_corners=True)."""
    if in_size == 1:
        return jnp.ones((out_size, 1), jnp.float32)
    s = jnp.arange(out_size, dtype=jnp.float32) * (in_size - 1) / (out_size - 1)
    i0 = jnp.floor(s).astype(jnp.int32)
    i1 = jnp.minimum(i0 + 1, in_size - 1)
    f = s - i0.astype(jnp.float32)
    rows = jnp.arange(out_size)
    a = jnp.zeros((out_size, in_size), jnp.float32)
    a = a.at[rows, i0].add(1.0 - f)
    a = a.at[rows, i1].add(f)
    return a


def up_forward(x1, x2, params):
    """Forward pass of `Up(in_channels=C1+C2, out_channels, bilinear=True)`."""
    n, c1, h_in, w_in = x1.shape
    n2, c2, h_out, w_out = x2.shape
    assert n == n2
    assert h_out == 2 * h_in and w_out == 2 * w_in, "see TODO(synk) about F.pad"
    hw_in = h_in * w_in
    hw = h_out * w_out
    cin = c1 + c2
    cmid = params["w1"].shape[0]
    cout = params["w2"].shape[0]
    assert params["w1"].shape[1] == cin

    f32 = jnp.float32
    pad = pl.cdiv(w_out + 1, 128) * 128            # lane-aligned interior offset / tail pad
    L = pad + hw + pad                             # flattened, zero-padded plane length

    x1_flat = x1.astype(f32).reshape(n, c1, hw_in)
    x2_padflat = jnp.zeros((n, c2, L), f32).at[:, :, pad:pad + hw].set(
        x2.astype(f32).reshape(n, c2, hw))

    # separable bilinear (align_corners=True) upsample as one (hw_in, hw) matrix
    mt = jnp.kron(_interp_matrix(h_out, h_in), _interp_matrix(w_out, w_in)).T.astype(f32)

    # per-tap (3x3) weight layout, split across the two concat channel groups
    w1t = jnp.transpose(params["w1"], (2, 3, 0, 1)).reshape(9, cmid, cin).astype(f32)
    w1a = w1t[:, :, :c2]      # applies to x2 (first channels of the concat)
    w1b = w1t[:, :, c2:]      # applies to up(x1)
    w2t = jnp.transpose(params["w2"], (2, 3, 0, 1)).reshape(9, cout, cmid).astype(f32)

    # fold conv bias + eval-mode BatchNorm into per-channel (scale, bias)
    eps = 1e-5
    s1 = params["g1"] / jnp.sqrt(params["v1"] + eps)
    b1 = params["be1"] + (params["b1"] - params["m1"]) * s1
    s2 = params["g2"] / jnp.sqrt(params["v2"] + eps)
    b2 = params["be2"] + (params["b2"] - params["m2"]) * s2
    sc1 = s1.reshape(cmid, 1).astype(f32)
    bi1 = b1.reshape(cmid, 1).astype(f32)
    sc2 = s2.reshape(cout, 1).astype(f32)
    bi2 = b2.reshape(cout, 1).astype(f32)

    # column-edge masks for the horizontal taps (zeros padding), hoisted out of the kernel
    col = jnp.arange(hw) % w_out
    masks = jnp.stack([col != 0,
                       jnp.ones((hw,), dtype=bool),
                       col != w_out - 1]).astype(f32)                        # (3, hw)

    kernel = functools.partial(_up_kernel, H=h_out, W=w_out, P=pad)
    out_flat = pl.pallas_call(
        kernel,
        out_shape=jax.ShapeDtypeStruct((n, cout, hw), f32),
        grid=(n,),
        in_specs=[
            pl.BlockSpec((1, c1, hw_in), lambda i: (i, 0, 0)),       # x1 (flattened)
            pl.BlockSpec((1, c2, L), lambda i: (i, 0, 0)),           # x2 (padded, flattened)
            pl.BlockSpec((hw_in, hw), lambda i: (0, 0)),             # upsample matrix
            pl.BlockSpec((9, cmid, c2), lambda i: (0, 0, 0)),        # conv1 weights (x2 part)
            pl.BlockSpec((9, cmid, c1), lambda i: (0, 0, 0)),        # conv1 weights (x1 part)
            pl.BlockSpec((cmid, 1), lambda i: (0, 0)),               # scale1
            pl.BlockSpec((cmid, 1), lambda i: (0, 0)),               # bias1
            pl.BlockSpec((9, cout, cmid), lambda i: (0, 0, 0)),      # conv2 weights
            pl.BlockSpec((cout, 1), lambda i: (0, 0)),               # scale2
            pl.BlockSpec((cout, 1), lambda i: (0, 0)),               # bias2
            pl.BlockSpec((3, hw), lambda i: (0, 0)),                 # edge masks
        ],
        out_specs=pl.BlockSpec((1, cout, hw), lambda i: (i, 0, 0)),
        scratch_shapes=[pltpu.VMEM((c1, L), f32),                    # padded up(x1)
                        pltpu.VMEM((cmid, L), f32)],                 # padded hidden h
        compiler_params=pltpu.CompilerParams(dimension_semantics=("parallel",)),
    )(x1_flat, x2_padflat, mt, w1a, w1b, sc1, bi1, w2t, sc2, bi2, masks)
    return out_flat.reshape(n, cout, h_out, w_out)


# ---------------------------------------------------------------- pure-JAX reference ---
def _upsample2x_ref(x):
    N, C, H, W = x.shape
    Ho, Wo = 2 * H, 2 * W

    def coords(out_n, in_n):
        s = jnp.arange(out_n, dtype=jnp.float32) * (in_n - 1) / (out_n - 1)
        i0 = jnp.floor(s).astype(jnp.int32)
        i1 = jnp.minimum(i0 + 1, in_n - 1)
        return i0, i1, s - i0.astype(jnp.float32)

    y0, y1, fy = coords(Ho, H)
    x0, x1, fx = coords(Wo, W)
    r0 = jnp.take(x, y0, axis=2)
    r1 = jnp.take(x, y1, axis=2)
    rows = r0 * (1.0 - fy)[None, None, :, None] + r1 * fy[None, None, :, None]
    c0 = jnp.take(rows, x0, axis=3)
    c1 = jnp.take(rows, x1, axis=3)
    return c0 * (1.0 - fx)[None, None, None, :] + c1 * fx[None, None, None, :]


def _ref_forward(x1, x2, p):
    xu = _upsample2x_ref(x1)
    x = jnp.concatenate([x2, xu], axis=1)

    def block(x, w, b, g, be, m, v):
        y = lax.conv_general_dilated(x, w, (1, 1), ((1, 1), (1, 1)),
                                     dimension_numbers=("NCHW", "OIHW", "NCHW"),
                                     precision=lax.Precision.HIGHEST)
        y = y + b[None, :, None, None]
        y = (y - m[None, :, None, None]) / jnp.sqrt(v[None, :, None, None] + 1e-5)
        y = y * g[None, :, None, None] + be[None, :, None, None]
        return jnp.maximum(y, 0.0)

    h = block(x, p["w1"], p["b1"], p["g1"], p["be1"], p["m1"], p["v1"])
    return block(h, p["w2"], p["b2"], p["g2"], p["be2"], p["m2"], p["v2"])


# ------------------------------------------------------------------------------- main ---
if __name__ == "__main__":
    key = jax.random.PRNGKey(0)
    keys = jax.random.split(key, 14)
    n, c1, c2 = 2, 4, 4            # x1: low-res features, x2: skip connection
    h_in = w_in = 8                # upsampled to 16x16 (matches x2)
    cin = c1 + c2                  # 8
    cmid = cin // 2                # DoubleConv mid_channels = in_channels // 2
    cout = 4

    x1 = jax.random.normal(keys[0], (n, c1, h_in, w_in), jnp.float32)
    x2 = jax.random.normal(keys[1], (n, c2, 2 * h_in, 2 * w_in), jnp.float32)
    params = {
        "w1": 0.1 * jax.random.normal(keys[2], (cmid, cin, 3, 3), jnp.float32),
        "b1": 0.1 * jax.random.normal(keys[3], (cmid,), jnp.float32),
        "g1": 1.0 + 0.1 * jax.random.normal(keys[4], (cmid,), jnp.float32),
        "be1": 0.1 * jax.random.normal(keys[5], (cmid,), jnp.float32),
        "m1": 0.1 * jax.random.normal(keys[6], (cmid,), jnp.float32),
        "v1": 0.5 + jax.random.uniform(keys[7], (cmid,), jnp.float32),
        "w2": 0.1 * jax.random.normal(keys[8], (cout, cmid, 3, 3), jnp.float32),
        "b2": 0.1 * jax.random.normal(keys[9], (cout,), jnp.float32),
        "g2": 1.0 + 0.1 * jax.random.normal(keys[10], (cout,), jnp.float32),
        "be2": 0.1 * jax.random.normal(keys[11], (cout,), jnp.float32),
        "m2": 0.1 * jax.random.normal(keys[12], (cout,), jnp.float32),
        "v2": 0.5 + jax.random.uniform(keys[13], (cout,), jnp.float32),
    }

    out = jax.block_until_ready(jax.jit(up_forward)(x1, x2, params))
    ref = jax.block_until_ready(_ref_forward(x1, x2, params))
    assert out.shape == ref.shape == (n, cout, 2 * h_in, 2 * w_in)
    max_err = float(jnp.max(jnp.abs(out - ref)))
    assert max_err < 1e-2, f"mismatch vs pure-JAX reference: max |err| = {max_err}"
    print("KERNEL_OK")
</pallas_src>

<mosaic_0001>
module attributes {stable_mosaic.version = 11 : i64} {
  func.func private @main(%arg0: i32) attributes {dimension_semantics = [#tpu.dimension_semantics<core_parallel>], iteration_bounds = array<i64: 2>, tpu.core_type = #tpu.core_type<sc_scalar_subcore>, window_params = []} {
    return
  }
}

module attributes {stable_mosaic.version = 11 : i64} {
  func.func private @main(%arg0: i32) attributes {dimension_semantics = [#tpu.dimension_semantics<core_parallel>], iteration_bounds = array<i64: 2>, tpu.core_type = #tpu.core_type<sc_scalar_subcore>, window_params = []} {
    return
  }
}

module attributes {stable_mosaic.version = 11 : i64} {
  func.func @_up_kernel(%arg0: i32, %arg1: memref<1x4x64xf32, #tpu.memory_space<vmem>>, %arg2: memref<1x4x512xf32, #tpu.memory_space<vmem>>, %arg3: memref<64x256xf32, #tpu.memory_space<vmem>>, %arg4: memref<9x4x4xf32, #tpu.memory_space<vmem>>, %arg5: memref<9x4x4xf32, #tpu.memory_space<vmem>>, %arg6: memref<4x1xf32, #tpu.memory_space<vmem>>, %arg7: memref<4x1xf32, #tpu.memory_space<vmem>>, %arg8: memref<9x4x4xf32, #tpu.memory_space<vmem>>, %arg9: memref<4x1xf32, #tpu.memory_space<vmem>>, %arg10: memref<4x1xf32, #tpu.memory_space<vmem>>, %arg11: memref<3x256xf32, #tpu.memory_space<vmem>>, %arg12: memref<1x4x256xf32, #tpu.memory_space<vmem>>, %arg13: memref<4x512xf32, #tpu.memory_space<vmem>>, %arg14: memref<4x512xf32, #tpu.memory_space<vmem>>) attributes {dimension_semantics = [#tpu.dimension_semantics<parallel>], iteration_bounds = array<i64: 2>, scalar_prefetch = 0 : i64, scratch_operands = 2 : i64, tpu.core_type = #tpu.core_type<tc>, window_params = [{transform_indices = @transform_0, window_bounds = array<i64: 1, 4, 64>}, {transform_indices = @transform_1, window_bounds = array<i64: 1, 4, 512>}, {pipeline_mode = #tpu.pipeline_mode<synchronous>, transform_indices = @transform_2, window_bounds = array<i64: 64, 256>}, {pipeline_mode = #tpu.pipeline_mode<synchronous>, transform_indices = @transform_3, window_bounds = array<i64: 9, 4, 4>}, {pipeline_mode = #tpu.pipeline_mode<synchronous>, transform_indices = @transform_4, window_bounds = array<i64: 9, 4, 4>}, {pipeline_mode = #tpu.pipeline_mode<synchronous>, transform_indices = @transform_5, window_bounds = array<i64: 4, 1>}, {pipeline_mode = #tpu.pipeline_mode<synchronous>, transform_indices = @transform_6, window_bounds = array<i64: 4, 1>}, {pipeline_mode = #tpu.pipeline_mode<synchronous>, transform_indices = @transform_7, window_bounds = array<i64: 9, 4, 4>}, {pipeline_mode = #tpu.pipeline_mode<synchronous>, transform_indices = @transform_8, window_bounds = array<i64: 4, 1>}, {pipeline_mode = #tpu.pipeline_mode<synchronous>, transform_indices = @transform_9, window_bounds = array<i64: 4, 1>}, {pipeline_mode = #tpu.pipeline_mode<synchronous>, transform_indices = @transform_10, window_bounds = array<i64: 3, 256>}, {transform_indices = @transform_11, window_bounds = array<i64: 1, 4, 256>}]} {
    %c0 = arith.constant 0 : index
    %c0_0 = arith.constant 0 : index
    %c0_1 = arith.constant 0 : index
    %0 = vector.load %arg1[%c0, %c0_0, %c0_1] : memref<1x4x64xf32, #tpu.memory_space<vmem>>, vector<1x4x64xf32>
    %1 = vector.shape_cast %0 : vector<1x4x64xf32> to vector<4x64xf32>
    %c0_2 = arith.constant 0 : index
    %c0_3 = arith.constant 0 : index
    %2 = vector.load %arg3[%c0_2, %c0_3] : memref<64x256xf32, #tpu.memory_space<vmem>>, vector<64x256xf32>
    %cst = arith.constant dense<0.000000e+00> : vector<4x256xf32>
    %3 = tpu.matmul %1, %2, %cst {dimension_numbers = #tpu.dot_dimension_numbers<[1], [0], [0], [1], [0, 0, 1, 1], [], []>} : vector<4x64xf32>, vector<64x256xf32>, vector<4x256xf32> -> vector<4x256xf32>
    %cst_4 = arith.constant 0.000000e+00 : f32
    %4 = vector.broadcast %cst_4 : f32 to vector<4x512xf32>
    %c0_5 = arith.constant 0 : index
    %c0_6 = arith.constant 0 : index
    %5 = vector.load %arg13[%c0_5, %c0_6] : memref<4x512xf32, #tpu.memory_space<vmem>>, vector<4x512xf32>
    tpu.vector_store %arg13[%c0_5, %c0_6], %4 {strides = array<i32>} : memref<4x512xf32, #tpu.memory_space<vmem>>, vector<4x512xf32>,
    %c0_7 = arith.constant 0 : index
    %c128 = arith.constant 128 : index
    %6 = vector.load %arg13[%c0_7, %c128] : memref<4x512xf32, #tpu.memory_space<vmem>>, vector<4x256xf32>
    tpu.vector_store %arg13[%c0_7, %c128], %3 {strides = array<i32>} : memref<4x512xf32, #tpu.memory_space<vmem>>, vector<4x256xf32>,
    %c0_8 = arith.constant 0 : index
    %c0_9 = arith.constant 0 : index
    %c0_10 = arith.constant 0 : index
    %7 = vector.load %arg2[%c0_8, %c0_9, %c0_10] : memref<1x4x512xf32, #tpu.memory_space<vmem>>, vector<1x4x512xf32>
    %8 = vector.shape_cast %7 : vector<1x4x512xf32> to vector<4x512xf32>
    %c0_11 = arith.constant 0 : index
    %c0_12 = arith.constant 0 : index
    %9 = vector.load %arg13[%c0_11, %c0_12] : memref<4x512xf32, #tpu.memory_space<vmem>>, vector<4x512xf32>
    %c0_13 = arith.constant 0 : index
    %c0_14 = arith.constant 0 : index
    %10 = vector.load %arg11[%c0_13, %c0_14] : memref<3x256xf32, #tpu.memory_space<vmem>>, vector<3x256xf32>
    %cst_15 = arith.constant 0.000000e+00 : f32
    %11 = vector.broadcast %cst_15 : f32 to vector<4x256xf32>
    %12 = vector.extract_strided_slice %8 {offsets = [0, 111], sizes = [4, 256], strides = [1, 1]} : vector<4x512xf32> to vector<4x256xf32>
    %13 = vector.extract_strided_slice %9 {offsets = [0, 111], sizes = [4, 256], strides = [1, 1]} : vector<4x512xf32> to vector<4x256xf32>
    %14 = vector.extract_strided_slice %10 {offsets = [0, 0], sizes = [1, 256], strides = [1, 1]} : vector<3x256xf32> to vector<1x256xf32>
    %15 = vector.broadcast %14 : vector<1x256xf32> to vector<4x256xf32>
    %16 = arith.mulf %12, %15 : vector<4x256xf32>
    %17 = vector.broadcast %14 : vector<1x256xf32> to vector<4x256xf32>
    %18 = arith.mulf %13, %17 : vector<4x256xf32>
    %c0_16 = arith.constant 0 : index
    %c0_17 = arith.constant 0 : index
    %c0_18 = arith.constant 0 : index
    %19 = vector.load %arg4[%c0_16, %c0_17, %c0_18] : memref<9x4x4xf32, #tpu.memory_space<vmem>>, vector<1x4x4xf32>
    %20 = vector.shape_cast %19 : vector<1x4x4xf32> to vector<4x4xf32>
    %cst_19 = arith.constant dense<0.000000e+00> : vector<4x256xf32>
    %21 = tpu.matmul %20, %16, %cst_19 {dimension_numbers = #tpu.dot_dimension_numbers<[1], [0], [0], [1], [0, 0, 1, 1], [], []>} : vector<4x4xf32>, vector<4x256xf32>, vector<4x256xf32> -> vector<4x256xf32>
    %22 = arith.addf %11, %21 : vector<4x256xf32>
    %c0_20 = arith.constant 0 : index
    %c0_21 = arith.constant 0 : index
    %c0_22 = arith.constant 0 : index
    %23 = vector.load %arg5[%c0_20, %c0_21, %c0_22] : memref<9x4x4xf32, #tpu.memory_space<vmem>>, vector<1x4x4xf32>
    %24 = vector.shape_cast %23 : vector<1x4x4xf32> to vector<4x4xf32>
    %cst_23 = arith.constant dense<0.000000e+00> : vector<4x256xf32>
    %25 = tpu.matmul %24, %18, %cst_23 {dimension_numbers = #tpu.dot_dimension_numbers<[1], [0], [0], [1], [0, 0, 1, 1], [], []>} : vector<4x4xf32>, vector<4x256xf32>, vector<4x256xf32> -> vector<4x256xf32>
    %26 = arith.addf %22, %25 : vector<4x256xf32>
    %27 = vector.extract_strided_slice %8 {offsets = [0, 112], sizes = [4, 256], strides = [1, 1]} : vector<4x512xf32> to vector<4x256xf32>
    %28 = vector.extract_strided_slice %9 {offsets = [0, 112], sizes = [4, 256], strides = [1, 1]} : vector<4x512xf32> to vector<4x256xf32>
    %c1 = arith.constant 1 : index
    %c0_24 = arith.constant 0 : index
    %c0_25 = arith.constant 0 : index
    %29 = vector.load %arg4[%c1, %c0_24, %c0_25] : memref<9x4x4xf32, #tpu.memory_space<vmem>>, vector<1x4x4xf32>
    %30 = vector.shape_cast %29 : vector<1x4x4xf32> to vector<4x4xf32>
    %cst_26 = arith.constant dense<0.000000e+00> : vector<4x256xf32>
    %31 = tpu.matmul %30, %27, %cst_26 {dimension_numbers = #tpu.dot_dimension_numbers<[1], [0], [0], [1], [0, 0, 1, 1], [], []>} : vector<4x4xf32>, vector<4x256xf32>, vector<4x256xf32> -> vector<4x256xf32>
    %32 = arith.addf %26, %31 : vector<4x256xf32>
    %c1_27 = arith.constant 1 : index
    %c0_28 = arith.constant 0 : index
    %c0_29 = arith.constant 0 : index
    %33 = vector.load %arg5[%c1_27, %c0_28, %c0_29] : memref<9x4x4xf32, #tpu.memory_space<vmem>>, vector<1x4x4xf32>
    %34 = vector.shape_cast %33 : vector<1x4x4xf32> to vector<4x4xf32>
    %cst_30 = arith.constant dense<0.000000e+00> : vector<4x256xf32>
    %35 = tpu.matmul %34, %28, %cst_30 {dimension_numbers = #tpu.dot_dimension_numbers<[1], [0], [0], [1], [0, 0, 1, 1], [], []>} : vector<4x4xf32>, vector<4x256xf32>, vector<4x256xf32> -> vector<4x256xf32>
    %36 = arith.addf %32, %35 : vector<4x256xf32>
    %37 = vector.extract_strided_slice %8 {offsets = [0, 113], sizes = [4, 256], strides = [1, 1]} : vector<4x512xf32> to vector<4x256xf32>
    %38 = vector.extract_strided_slice %9 {offsets = [0, 113], sizes = [4, 256], strides = [1, 1]} : vector<4x512xf32> to vector<4x256xf32>
    %39 = vector.extract_strided_slice %10 {offsets = [2, 0], sizes = [1, 256], strides = [1, 1]} : vector<3x256xf32> to vector<1x256xf32>
    %40 = vector.broadcast %39 : vector<1x256xf32> to vector<4x256xf32>
    %41 = arith.mulf %37, %40 : vector<4x256xf32>
    %42 = vector.broadcast %39 : vector<1x256xf32> to vector<4x256xf32>
    %43 = arith.mulf %38, %42 : vector<4x256xf32>
    %c2 = arith.constant 2 : index
    %c0_31 = arith.constant 0 : index
    %c0_32 = arith.constant 0 : index
    %44 = vector.load %arg4[%c2, %c0_31, %c0_32] : memref<9x4x4xf32, #tpu.memory_space<vmem>>, vector<1x4x4xf32>
    %45 = vector.shape_cast %44 : vector<1x4x4xf32> to vector<4x4xf32>
    %cst_33 = arith.constant dense<0.000000e+00> : vector<4x256xf32>
    %46 = tpu.matmul %45, %41, %cst_33 {dimension_numbers = #tpu.dot_dimension_numbers<[1], [0], [0], [1], [0, 0, 1, 1], [], []>} : vector<4x4xf32>, vector<4x256xf32>, vector<4x256xf32> -> vector<4x256xf32>
    %47 = arith.addf %36, %46 : vector<4x256xf32>
    %c2_34 = arith.constant 2 : index
    %c0_35 = arith.constant 0 : index
    %c0_36 = arith.constant 0 : index
    %48 = vector.load %arg5[%c2_34, %c0_35, %c0_36] : memref<9x4x4xf32, #tpu.memory_space<vmem>>, vector<1x4x4xf32>
    %49 = vector.shape_cast %48 : vector<1x4x4xf32> to vector<4x4xf32>
    %cst_37 = arith.constant dense<0.000000e+00> : vector<4x256xf32>
    %50 = tpu.matmul %49, %43, %cst_37 {dimension_numbers = #tpu.dot_dimension_numbers<[1], [0], [0], [1], [0, 0, 1, 1], [], []>} : vector<4x4xf32>, vector<4x256xf32>, vector<4x256xf32> -> vector<4x256xf32>
    %51 = arith.addf %47, %50 : vector<4x256xf32>
    %52 = vector.extract_strided_slice %8 {offsets = [0, 127], sizes = [4, 256], strides = [1, 1]} : vector<4x512xf32> to vector<4x256xf32>
    %53 = vector.extract_strided_slice %9 {offsets = [0, 127], sizes = [4, 256], strides = [1, 1]} : vector<4x512xf32> to vector<4x256xf32>
    %54 = vector.extract_strided_slice %10 {offsets = [0, 0], sizes = [1, 256], strides = [1, 1]} : vector<3x256xf32> to vector<1x256xf32>
    %55 = vector.broadcast %54 : vector<1x256xf32> to vector<4x256xf32>
    %56 = arith.mulf %52, %55 : vector<4x256xf32>
    %57 = vector.broadcast %54 : vector<1x256xf32> to vector<4x256xf32>
    %58 = arith.mulf %53, %57 : vector<4x256xf32>
    %c3 = arith.constant 3 : index
    %c0_38 = arith.constant 0 : index
    %c0_39 = arith.constant 0 : index
    %59 = vector.load %arg4[%c3, %c0_38, %c0_39] : memref<9x4x4xf32, #tpu.memory_space<vmem>>, vector<1x4x4xf32>
    %60 = vector.shape_cast %59 : vector<1x4x4xf32> to vector<4x4xf32>
    %cst_40 = arith.constant dense<0.000000e+00> : vector<4x256xf32>
    %61 = tpu.matmul %60, %56, %cst_40 {dimension_numbers = #tpu.dot_dimension_numbers<[1], [0], [0], [1], [0, 0, 1, 1], [], []>} : vector<4x4xf32>, vector<4x256xf32>, vector<4x256xf32> -> vector<4x256xf32>
    %62 = arith.addf %51, %61 : vector<4x256xf32>
    %c3_41 = arith.constant 3 : index
    %c0_42 = arith.constant 0 : index
    %c0_43 = arith.constant 0 : index
    %63 = vector.load %arg5[%c3_41, %c0_42, %c0_43] : memref<9x4x4xf32, #tpu.memory_space<vmem>>, vector<1x4x4xf32>
    %64 = vector.shape_cast %63 : vector<1x4x4xf32> to vector<4x4xf32>
    %cst_44 = arith.constant dense<0.000000e+00> : vector<4x256xf32>
    %65 = tpu.matmul %64, %58, %cst_44 {dimension_numbers = #tpu.dot_dimension_numbers<[1], [0], [0], [1], [0, 0, 1, 1], [], []>} : vector<4x4xf32>, vector<4x256xf32>, vector<4x256xf32> -> vector<4x256xf32>
    %66 = arith.addf %62, %65 : vector<4x256xf32>
    %67 = vector.extract_strided_slice %8 {offsets = [0, 128], sizes = [4, 256], strides = [1, 1]} : vector<4x512xf32> to vector<4x256xf32>
    %68 = vector.extract_strided_slice %9 {offsets = [0, 128], sizes = [4, 256], strides = [1, 1]} : vector<4x512xf32> to vector<4x256xf32>
    %c4 = arith.constant 4 : index
    %c0_45 = arith.constant 0 : index
    %c0_46 = arith.constant 0 : index
    %69 = vector.load %arg4[%c4, %c0_45, %c0_46] : memref<9x4x4xf32, #tpu.memory_space<vmem>>, vector<1x4x4xf32>
    %70 = vector.shape_cast %69 : vector<1x4x4xf32> to vector<4x4xf32>
    %cst_47 = arith.constant dense<0.000000e+00> : vector<4x256xf32>
    %71 = tpu.matmul %70, %67, %cst_47 {dimension_numbers = #tpu.dot_dimension_numbers<[1], [0], [0], [1], [0, 0, 1, 1], [], []>} : vector<4x4xf32>, vector<4x256xf32>, vector<4x256xf32> -> vector<4x256xf32>
    %72 = arith.addf %66, %71 : vector<4x256xf32>
    %c4_48 = arith.constant 4 : index
    %c0_49 = arith.constant 0 : index
    %c0_50 = arith.constant 0 : index
    %73 = vector.load %arg5[%c4_48, %c0_49, %c0_50] : memref<9x4x4xf32, #tpu.memory_space<vmem>>, vector<1x4x4xf32>
    %74 = vector.shape_cast %73 : vector<1x4x4xf32> to vector<4x4xf32>
    %cst_51 = arith.constant dense<0.000000e+00> : vector<4x256xf32>
    %75 = tpu.matmul %74, %68, %cst_51 {dimension_numbers = #tpu.dot_dimension_numbers<[1], [0], [0], [1], [0, 0, 1, 1], [], []>} : vector<4x4xf32>, vector<4x256xf32>, vector<4x256xf32> -> vector<4x256xf32>
    %76 = arith.addf %72, %75 : vector<4x256xf32>
    %77 = vector.extract_strided_slice %8 {offsets = [0, 129], sizes = [4, 256], strides = [1, 1]} : vector<4x512xf32> to vector<4x256xf32>
    %78 = vector.extract_strided_slice %9 {offsets = [0, 129], sizes = [4, 256], strides = [1, 1]} : vector<4x512xf32> to vector<4x256xf32>
    %79 = vector.extract_strided_slice %10 {offsets = [2, 0], sizes = [1, 256], strides = [1, 1]} : vector<3x256xf32> to vector<1x256xf32>
    %80 = vector.broadcast %79 : vector<1x256xf32> to vector<4x256xf32>
    %81 = arith.mulf %77, %80 : vector<4x256xf32>
    %82 = vector.broadcast %79 : vector<1x256xf32> to vector<4x256xf32>
    %83 = arith.mulf %78, %82 : vector<4x256xf32>
    %c5 = arith.constant 5 : index
    %c0_52 = arith.constant 0 : index
    %c0_53 = arith.constant 0 : index
    %84 = vector.load %arg4[%c5, %c0_52, %c0_53] : memref<9x4x4xf32, #tpu.memory_space<vmem>>, vector<1x4x4xf32>
    %85 = vector.shape_cast %84 : vector<1x4x4xf32> to vector<4x4xf32>
    %cst_54 = arith.constant dense<0.000000e+00> : vector<4x256xf32>
    %86 = tpu.matmul %85, %81, %cst_54 {dimension_numbers = #tpu.dot_dimension_numbers<[1], [0], [0], [1], [0, 0, 1, 1], [], []>} : vector<4x4xf32>, vector<4x256xf32>, vector<4x256xf32> -> vector<4x256xf32>
    %87 = arith.addf %76, %86 : vector<4x256xf32>
    %c5_55 = arith.constant 5 : index
    %c0_56 = arith.constant 0 : index
    %c0_57 = arith.constant 0 : index
    %88 = vector.load %arg5[%c5_55, %c0_56, %c0_57] : memref<9x4x4xf32, #tpu.memory_space<vmem>>, vector<1x4x4xf32>
    %89 = vector.shape_cast %88 : vector<1x4x4xf32> to vector<4x4xf32>
    %cst_58 = arith.constant dense<0.000000e+00> : vector<4x256xf32>
    %90 = tpu.matmul %89, %83, %cst_58 {dimension_numbers = #tpu.dot_dimension_numbers<[1], [0], [0], [1], [0, 0, 1, 1], [], []>} : vector<4x4xf32>, vector<4x256xf32>, vector<4x256xf32> -> vector<4x256xf32>
    %91 = arith.addf %87, %90 : vector<4x256xf32>
    %92 = vector.extract_strided_slice %8 {offsets = [0, 143], sizes = [4, 256], strides = [1, 1]} : vector<4x512xf32> to vector<4x256xf32>
    %93 = vector.extract_strided_slice %9 {offsets = [0, 143], sizes = [4, 256], strides = [1, 1]} : vector<4x512xf32> to vector<4x256xf32>
    %94 = vector.extract_strided_slice %10 {offsets = [0, 0], sizes = [1, 256], strides = [1, 1]} : vector<3x256xf32> to vector<1x256xf32>
    %95 = vector.broadcast %94 : vector<1x256xf32> to vector<4x256xf32>
    %96 = arith.mulf %92, %95 : vector<4x256xf32>
    %97 = vector.broadcast %94 : vector<1x256xf32> to vector<4x256xf32>
    %98 = arith.mulf %93, %97 : vector<4x256xf32>
    %c6 = arith.constant 6 : index
    %c0_59 = arith.constant 0 : index
    %c0_60 = arith.constant 0 : index
    %99 = vector.load %arg4[%c6, %c0_59, %c0_60] : memref<9x4x4xf32, #tpu.memory_space<vmem>>, vector<1x4x4xf32>
    %100 = vector.shape_cast %99 : vector<1x4x4xf32> to vector<4x4xf32>
    %cst_61 = arith.constant dense<0.000000e+00> : vector<4x256xf32>
    %101 = tpu.matmul %100, %96, %cst_61 {dimension_numbers = #tpu.dot_dimension_numbers<[1], [0], [0], [1], [0, 0, 1, 1], [], []>} : vector<4x4xf32>, vector<4x256xf32>, vector<4x256xf32> -> vector<4x256xf32>
    %102 = arith.addf %91, %101 : vector<4x256xf32>
    %c6_62 = arith.constant 6 : index
    %c0_63 = arith.constant 0 : index
    %c0_64 = arith.constant 0 : index
    %103 = vector.load %arg5[%c6_62, %c0_63, %c0_64] : memref<9x4x4xf32, #tpu.memory_space<vmem>>, vector<1x4x4xf32>
    %104 = vector.shape_cast %103 : vector<1x4x4xf32> to vector<4x4xf32>
    %cst_65 = arith.constant dense<0.000000e+00> : vector<4x256xf32>
    %105 = tpu.matmul %104, %98, %cst_65 {dimension_numbers = #tpu.dot_dimension_numbers<[1], [0], [0], [1], [0, 0, 1, 1], [], []>} : vector<4x4xf32>, vector<4x256xf32>, vector<4x256xf32> -> vector<4x256xf32>
    %106 = arith.addf %102, %105 : vector<4x256xf32>
    %107 = vector.extract_strided_slice %8 {offsets = [0, 144], sizes = [4, 256], strides = [1, 1]} : vector<4x512xf32> to vector<4x256xf32>
    %108 = vector.extract_strided_slice %9 {offsets = [0, 144], sizes = [4, 256], strides = [1, 1]} : vector<4x512xf32> to vector<4x256xf32>
    %c7 = arith.constant 7 : index
    %c0_66 = arith.constant 0 : index
    %c0_67 = arith.constant 0 : index
    %109 = vector.load %arg4[%c7, %c0_66, %c0_67] : memref<9x4x4xf32, #tpu.memory_space<vmem>>, vector<1x4x4xf32>
    %110 = vector.shape_cast %109 : vector<1x4x4xf32> to vector<4x4xf32>
    %cst_68 = arith.constant dense<0.000000e+00> : vector<4x256xf32>
    %111 = tpu.matmul %110, %107, %cst_68 {dimension_numbers = #tpu.dot_dimension_numbers<[1], [0], [0], [1], [0, 0, 1, 1], [], []>} : vector<4x4xf32>, vector<4x256xf32>, vector<4x256xf32> -> vector<4x256xf32>
    %112 = arith.addf %106, %111 : vector<4x256xf32>
    %c7_69 = arith.constant 7 : index
    %c0_70 = arith.constant 0 : index
    %c0_71 = arith.constant 0 : index
    %113 = vector.load %arg5[%c7_69, %c0_70, %c0_71] : memref<9x4x4xf32, #tpu.memory_space<vmem>>, vector<1x4x4xf32>
    %114 = vector.shape_cast %113 : vector<1x4x4xf32> to vector<4x4xf32>
    %cst_72 = arith.constant dense<0.000000e+00> : vector<4x256xf32>
    %115 = tpu.matmul %114, %108, %cst_72 {dimension_numbers = #tpu.dot_dimension_numbers<[1], [0], [0], [1], [0, 0, 1, 1], [], []>} : vector<4x4xf32>, vector<4x256xf32>, vector<4x256xf32> -> vector<4x256xf32>
    %116 = arith.addf %112, %115 : vector<4x256xf32>
    %117 = vector.extract_strided_slice %8 {offsets = [0, 145], sizes = [4, 256], strides = [1, 1]} : vector<4x512xf32> to vector<4x256xf32>
    %118 = vector.extract_strided_slice %9 {offsets = [0, 145], sizes = [4, 256], strides = [1, 1]} : vector<4x512xf32> to vector<4x256xf32>
    %119 = vector.extract_strided_slice %10 {offsets = [2, 0], sizes = [1, 256], strides = [1, 1]} : vector<3x256xf32> to vector<1x256xf32>
    %120 = vector.broadcast %119 : vector<1x256xf32> to vector<4x256xf32>
    %121 = arith.mulf %117, %120 : vector<4x256xf32>
    %122 = vector.broadcast %119 : vector<1x256xf32> to vector<4x256xf32>
    %123 = arith.mulf %118, %122 : vector<4x256xf32>
    %c8 = arith.constant 8 : index
    %c0_73 = arith.constant 0 : index
    %c0_74 = arith.constant 0 : index
    %124 = vector.load %arg4[%c8, %c0_73, %c0_74] : memref<9x4x4xf32, #tpu.memory_space<vmem>>, vector<1x4x4xf32>
    %125 = vector.shape_cast %124 : vector<1x4x4xf32> to vector<4x4xf32>
    %cst_75 = arith.constant dense<0.000000e+00> : vector<4x256xf32>
    %126 = tpu.matmul %125, %121, %cst_75 {dimension_numbers = #tpu.dot_dimension_numbers<[1], [0], [0], [1], [0, 0, 1, 1], [], []>} : vector<4x4xf32>, vector<4x256xf32>, vector<4x256xf32> -> vector<4x256xf32>
    %127 = arith.addf %116, %126 : vector<4x256xf32>
    %c8_76 = arith.constant 8 : index
    %c0_77 = arith.constant 0 : index
    %c0_78 = arith.constant 0 : index
    %128 = vector.load %arg5[%c8_76, %c0_77, %c0_78] : memref<9x4x4xf32, #tpu.memory_space<vmem>>, vector<1x4x4xf32>
    %129 = vector.shape_cast %128 : vector<1x4x4xf32> to vector<4x4xf32>
    %cst_79 = arith.constant dense<0.000000e+00> : vector<4x256xf32>
    %130 = tpu.matmul %129, %123, %cst_79 {dimension_numbers = #tpu.dot_dimension_numbers<[1], [0], [0], [1], [0, 0, 1, 1], [], []>} : vector<4x4xf32>, vector<4x256xf32>, vector<4x256xf32> -> vector<4x256xf32>
    %131 = arith.addf %127, %130 : vector<4x256xf32>
    %c0_80 = arith.constant 0 : index
    %c0_81 = arith.constant 0 : index
    %132 = vector.load %arg6[%c0_80, %c0_81] : memref<4x1xf32, #tpu.memory_space<vmem>>, vector<4x1xf32>
    %133 = vector.broadcast %132 : vector<4x1xf32> to vector<4x256xf32>
    %134 = arith.mulf %131, %133 : vector<4x256xf32>
    %c0_82 = arith.constant 0 : index
    %c0_83 = arith.constant 0 : index
    %135 = vector.load %arg7[%c0_82, %c0_83] : memref<4x1xf32, #tpu.memory_space<vmem>>, vector<4x1xf32>
    %136 = vector.broadcast %135 : vector<4x1xf32> to vector<4x256xf32>
    %137 = arith.addf %134, %136 : vector<4x256xf32>
    %cst_84 = arith.constant 0.000000e+00 : f32
    %138 = vector.broadcast %cst_84 : f32 to vector<4x256xf32>
    %139 = arith.maximumf %137, %138 : vector<4x256xf32>
    %cst_85 = arith.constant 0.000000e+00 : f32
    %140 = vector.broadcast %cst_85 : f32 to vector<4x512xf32>
    %c0_86 = arith.constant 0 : index
    %c0_87 = arith.constant 0 : index
    %141 = vector.load %arg14[%c0_86, %c0_87] : memref<4x512xf32, #tpu.memory_space<vmem>>, vector<4x512xf32>
    tpu.vector_store %arg14[%c0_86, %c0_87], %140 {strides = array<i32>} : memref<4x512xf32, #tpu.memory_space<vmem>>, vector<4x512xf32>,
    %c0_88 = arith.constant 0 : index
    %c128_89 = arith.constant 128 : index
    %142 = vector.load %arg14[%c0_88, %c128_89] : memref<4x512xf32, #tpu.memory_space<vmem>>, vector<4x256xf32>
    tpu.vector_store %arg14[%c0_88, %c128_89], %139 {strides = array<i32>} : memref<4x512xf32, #tpu.memory_space<vmem>>, vector<4x256xf32>,
    %c0_90 = arith.constant 0 : index
    %c0_91 = arith.constant 0 : index
    %143 = vector.load %arg14[%c0_90, %c0_91] : memref<4x512xf32, #tpu.memory_space<vmem>>, vector<4x512xf32>
    %cst_92 = arith.constant 0.000000e+00 : f32
    %144 = vector.broadcast %cst_92 : f32 to vector<4x256xf32>
    %145 = vector.extract_strided_slice %143 {offsets = [0, 111], sizes = [4, 256], strides = [1, 1]} : vector<4x512xf32> to vector<4x256xf32>
    %146 = vector.extract_strided_slice %10 {offsets = [0, 0], sizes = [1, 256], strides = [1, 1]} : vector<3x256xf32> to vector<1x256xf32>
    %147 = vector.broadcast %146 : vector<1x256xf32> to vector<4x256xf32>
    %148 = arith.mulf %145, %147 : vector<4x256xf32>
    %c0_93 = arith.constant 0 : index
    %c0_94 = arith.constant 0 : index
    %c0_95 = arith.constant 0 : index
    %149 = vector.load %arg8[%c0_93, %c0_94, %c0_95] : memref<9x4x4xf32, #tpu.memory_space<vmem>>, vector<1x4x4xf32>
    %150 = vector.shape_cast %149 : vector<1x4x4xf32> to vector<4x4xf32>
    %cst_96 = arith.constant dense<0.000000e+00> : vector<4x256xf32>
    %151 = tpu.matmul %150, %148, %cst_96 {dimension_numbers = #tpu.dot_dimension_numbers<[1], [0], [0], [1], [0, 0, 1, 1], [], []>} : vector<4x4xf32>, vector<4x256xf32>, vector<4x256xf32> -> vector<4x256xf32>
    %152 = arith.addf %144, %151 : vector<4x256xf32>
    %153 = vector.extract_strided_slice %143 {offsets = [0, 112], sizes = [4, 256], strides = [1, 1]} : vector<4x512xf32> to vector<4x256xf32>
    %c1_97 = arith.constant 1 : index
    %c0_98 = arith.constant 0 : index
    %c0_99 = arith.constant 0 : index
    %154 = vector.load %arg8[%c1_97, %c0_98, %c0_99] : memref<9x4x4xf32, #tpu.memory_space<vmem>>, vector<1x4x4xf32>
    %155 = vector.shape_cast %154 : vector<1x4x4xf32> to vector<4x4xf32>
    %cst_100 = arith.constant dense<0.000000e+00> : vector<4x256xf32>
    %156 = tpu.matmul %155, %153, %cst_100 {dimension_numbers = #tpu.dot_dimension_numbers<[1], [0], [0], [1], [0, 0, 1, 1], [], []>} : vector<4x4xf32>, vector<4x256xf32>, vector<4x256xf32> -> vector<4x256xf32>
    %157 = arith.addf %152, %156 : vector<4x256xf32>
    %158 = vector.extract_strided_slice %143 {offsets = [0, 113], sizes = [4, 256], strides = [1, 1]} : vector<4x512xf32> to vector<4x256xf32>
    %159 = vector.extract_strided_slice %10 {offsets = [2, 0], sizes = [1, 256], strides = [1, 1]} : vector<3x256xf32> to vector<1x256xf32>
    %160 = vector.broadcast %159 : vector<1x256xf32> to vector<4x256xf32>
    %161 = arith.mulf %158, %160 : vector<4x256xf32>
    %c2_101 = arith.constant 2 : index
    %c0_102 = arith.constant 0 : index
    %c0_103 = arith.constant 0 : index
    %162 = vector.load %arg8[%c2_101, %c0_102, %c0_103] : memref<9x4x4xf32, #tpu.memory_space<vmem>>, vector<1x4x4xf32>
    %163 = vector.shape_cast %162 : vector<1x4x4xf32> to vector<4x4xf32>
    %cst_104 = arith.constant dense<0.000000e+00> : vector<4x256xf32>
    %164 = tpu.matmul %163, %161, %cst_104 {dimension_numbers = #tpu.dot_dimension_numbers<[1], [0], [0], [1], [0, 0, 1, 1], [], []>} : vector<4x4xf32>, vector<4x256xf32>, vector<4x256xf32> -> vector<4x256xf32>
    %165 = arith.addf %157, %164 : vector<4x256xf32>
    %166 = vector.extract_strided_slice %143 {offsets = [0, 127], sizes = [4, 256], strides = [1, 1]} : vector<4x512xf32> to vector<4x256xf32>
    %167 = vector.extract_strided_slice %10 {offsets = [0, 0], sizes = [1, 256], strides = [1, 1]} : vector<3x256xf32> to vector<1x256xf32>
    %168 = vector.broadcast %167 : vector<1x256xf32> to vector<4x256xf32>
    %169 = arith.mulf %166, %168 : vector<4x256xf32>
    %c3_105 = arith.constant 3 : index
    %c0_106 = arith.constant 0 : index
    %c0_107 = arith.constant 0 : index
    %170 = vector.load %arg8[%c3_105, %c0_106, %c0_107] : memref<9x4x4xf32, #tpu.memory_space<vmem>>, vector<1x4x4xf32>
    %171 = vector.shape_cast %170 : vector<1x4x4xf32> to vector<4x4xf32>
    %cst_108 = arith.constant dense<0.000000e+00> : vector<4x256xf32>
    %172 = tpu.matmul %171, %169, %cst_108 {dimension_numbers = #tpu.dot_dimension_numbers<[1], [0], [0], [1], [0, 0, 1, 1], [], []>} : vector<4x4xf32>, vector<4x256xf32>, vector<4x256xf32> -> vector<4x256xf32>
    %173 = arith.addf %165, %172 : vector<4x256xf32>
    %174 = vector.extract_strided_slice %143 {offsets = [0, 128], sizes = [4, 256], strides = [1, 1]} : vector<4x512xf32> to vector<4x256xf32>
    %c4_109 = arith.constant 4 : index
    %c0_110 = arith.constant 0 : index
    %c0_111 = arith.constant 0 : index
    %175 = vector.load %arg8[%c4_109, %c0_110, %c0_111] : memref<9x4x4xf32, #tpu.memory_space<vmem>>, vector<1x4x4xf32>
    %176 = vector.shape_cast %175 : vector<1x4x4xf32> to vector<4x4xf32>
    %cst_112 = arith.constant dense<0.000000e+00> : vector<4x256xf32>
    %177 = tpu.matmul %176, %174, %cst_112 {dimension_numbers = #tpu.dot_dimension_numbers<[1], [0], [0], [1], [0, 0, 1, 1], [], []>} : vector<4x4xf32>, vector<4x256xf32>, vector<4x256xf32> -> vector<4x256xf32>
    %178 = arith.addf %173, %177 : vector<4x256xf32>
    %179 = vector.extract_strided_slice %143 {offsets = [0, 129], sizes = [4, 256], strides = [1, 1]} : vector<4x512xf32> to vector<4x256xf32>
    %180 = vector.extract_strided_slice %10 {offsets = [2, 0], sizes = [1, 256], strides = [1, 1]} : vector<3x256xf32> to vector<1x256xf32>
    %181 = vector.broadcast %180 : vector<1x256xf32> to vector<4x256xf32>
    %182 = arith.mulf %179, %181 : vector<4x256xf32>
    %c5_113 = arith.constant 5 : index
    %c0_114 = arith.constant 0 : index
    %c0_115 = arith.constant 0 : index
    %183 = vector.load %arg8[%c5_113, %c0_114, %c0_115] : memref<9x4x4xf32, #tpu.memory_space<vmem>>, vector<1x4x4xf32>
    %184 = vector.shape_cast %183 : vector<1x4x4xf32> to vector<4x4xf32>
    %cst_116 = arith.constant dense<0.000000e+00> : vector<4x256xf32>
    %185 = tpu.matmul %184, %182, %cst_116 {dimension_numbers = #tpu.dot_dimension_numbers<[1], [0], [0], [1], [0, 0, 1, 1], [], []>} : vector<4x4xf32>, vector<4x256xf32>, vector<4x256xf32> -> vector<4x256xf32>
    %186 = arith.addf %178, %185 : vector<4x256xf32>
    %187 = vector.extract_strided_slice %143 {offsets = [0, 143], sizes = [4, 256], strides = [1, 1]} : vector<4x512xf32> to vector<4x256xf32>
    %188 = vector.extract_strided_slice %10 {offsets = [0, 0], sizes = [1, 256], strides = [1, 1]} : vector<3x256xf32> to vector<1x256xf32>
    %189 = vector.broadcast %188 : vector<1x256xf32> to vector<4x256xf32>
    %190 = arith.mulf %187, %189 : vector<4x256xf32>
    %c6_117 = arith.constant 6 : index
    %c0_118 = arith.constant 0 : index
    %c0_119 = arith.constant 0 : index
    %191 = vector.load %arg8[%c6_117, %c0_118, %c0_119] : memref<9x4x4xf32, #tpu.memory_space<vmem>>, vector<1x4x4xf32>
    %192 = vector.shape_cast %191 : vector<1x4x4xf32> to vector<4x4xf32>
    %cst_120 = arith.constant dense<0.000000e+00> : vector<4x256xf32>
    %193 = tpu.matmul %192, %190, %cst_120 {dimension_numbers = #tpu.dot_dimension_numbers<[1], [0], [0], [1], [0, 0, 1, 1], [], []>} : vector<4x4xf32>, vector<4x256xf32>, vector<4x256xf32> -> vector<4x256xf32>
    %194 = arith.addf %186, %193 : vector<4x256xf32>
    %195 = vector.extract_strided_slice %143 {offsets = [0, 144], sizes = [4, 256], strides = [1, 1]} : vector<4x512xf32> to vector<4x256xf32>
    %c7_121 = arith.constant 7 : index
    %c0_122 = arith.constant 0 : index
    %c0_123 = arith.constant 0 : index
    %196 = vector.load %arg8[%c7_121, %c0_122, %c0_123] : memref<9x4x4xf32, #tpu.memory_space<vmem>>, vector<1x4x4xf32>
    %197 = vector.shape_cast %196 : vector<1x4x4xf32> to vector<4x4xf32>
    %cst_124 = arith.constant dense<0.000000e+00> : vector<4x256xf32>
    %198 = tpu.matmul %197, %195, %cst_124 {dimension_numbers = #tpu.dot_dimension_numbers<[1], [0], [0], [1], [0, 0, 1, 1], [], []>} : vector<4x4xf32>, vector<4x256xf32>, vector<4x256xf32> -> vector<4x256xf32>
    %199 = arith.addf %194, %198 : vector<4x256xf32>
    %200 = vector.extract_strided_slice %143 {offsets = [0, 145], sizes = [4, 256], strides = [1, 1]} : vector<4x512xf32> to vector<4x256xf32>
    %201 = vector.extract_strided_slice %10 {offsets = [2, 0], sizes = [1, 256], strides = [1, 1]} : vector<3x256xf32> to vector<1x256xf32>
    %202 = vector.broadcast %201 : vector<1x256xf32> to vector<4x256xf32>
    %203 = arith.mulf %200, %202 : vector<4x256xf32>
    %c8_125 = arith.constant 8 : index
    %c0_126 = arith.constant 0 : index
    %c0_127 = arith.constant 0 : index
    %204 = vector.load %arg8[%c8_125, %c0_126, %c0_127] : memref<9x4x4xf32, #tpu.memory_space<vmem>>, vector<1x4x4xf32>
    %205 = vector.shape_cast %204 : vector<1x4x4xf32> to vector<4x4xf32>
    %cst_128 = arith.constant dense<0.000000e+00> : vector<4x256xf32>
    %206 = tpu.matmul %205, %203, %cst_128 {dimension_numbers = #tpu.dot_dimension_numbers<[1], [0], [0], [1], [0, 0, 1, 1], [], []>} : vector<4x4xf32>, vector<4x256xf32>, vector<4x256xf32> -> vector<4x256xf32>
    %207 = arith.addf %199, %206 : vector<4x256xf32>
    %c0_129 = arith.constant 0 : index
    %c0_130 = arith.constant 0 : index
    %208 = vector.load %arg9[%c0_129, %c0_130] : memref<4x1xf32, #tpu.memory_space<vmem>>, vector<4x1xf32>
    %209 = vector.broadcast %208 : vector<4x1xf32> to vector<4x256xf32>
    %210 = arith.mulf %207, %209 : vector<4x256xf32>
    %c0_131 = arith.constant 0 : index
    %c0_132 = arith.constant 0 : index
    %211 = vector.load %arg10[%c0_131, %c0_132] : memref<4x1xf32, #tpu.memory_space<vmem>>, vector<4x1xf32>
    %212 = vector.broadcast %211 : vector<4x1xf32> to vector<4x256xf32>
    %213 = arith.addf %210, %212 : vector<4x256xf32>
    %cst_133 = arith.constant 0.000000e+00 : f32
    %214 = vector.broadcast %cst_133 : f32 to vector<4x256xf32>
    %215 = arith.maximumf %213, %214 : vector<4x256xf32>
    %c0_134 = arith.constant 0 : index
    %c0_135 = arith.constant 0 : index
    %c0_136 = arith.constant 0 : index
    %216 = vector.load %arg12[%c0_134, %c0_135, %c0_136] : memref<1x4x256xf32, #tpu.memory_space<vmem>>, vector<1x4x256xf32>
    %217 = vector.shape_cast %216 : vector<1x4x256xf32> to vector<4x256xf32>
    %218 = vector.shape_cast %215 : vector<4x256xf32> to vector<1x4x256xf32>
    tpu.vector_store %arg12[%c0_134, %c0_135, %c0_136], %218 {strides = array<i32>} : memref<1x4x256xf32, #tpu.memory_space<vmem>>, vector<1x4x256xf32>,
    return
  }
  func.func @transform_0(%arg0: i32) -> (i32, i32, i32) {
    %c0_i32 = arith.constant 0 : i32
    %c0_i32_0 = arith.constant 0 : i32
    %c0_i32_1 = arith.constant 0 : i32
    return %arg0, %c0_i32, %c0_i32_0 : i32, i32, i32
  }
  func.func @transform_1(%arg0: i32) -> (i32, i32, i32) {
    %c0_i32 = arith.constant 0 : i32
    %c0_i32_0 = arith.constant 0 : i32
    %c0_i32_1 = arith.constant 0 : i32
    return %arg0, %c0_i32, %c0_i32_0 : i32, i32, i32
  }
  func.func @transform_2(%arg0: i32) -> (i32, i32) {
    %c0_i32 = arith.constant 0 : i32
    %c0_i32_0 = arith.constant 0 : i32
    %c0_i32_1 = arith.constant 0 : i32
    return %c0_i32, %c0_i32_0 : i32, i32
  }
  func.func @transform_3(%arg0: i32) -> (i32, i32, i32) {
    %c0_i32 = arith.constant 0 : i32
    %c0_i32_0 = arith.constant 0 : i32
    %c0_i32_1 = arith.constant 0 : i32
    %c0_i32_2 = arith.constant 0 : i32
    return %c0_i32, %c0_i32_0, %c0_i32_1 : i32, i32, i32
  }
  func.func @transform_4(%arg0: i32) -> (i32, i32, i32) {
    %c0_i32 = arith.constant 0 : i32
    %c0_i32_0 = arith.constant 0 : i32
    %c0_i32_1 = arith.constant 0 : i32
    %c0_i32_2 = arith.constant 0 : i32
    return %c0_i32, %c0_i32_0, %c0_i32_1 : i32, i32, i32
  }
  func.func @transform_5(%arg0: i32) -> (i32, i32) {
    %c0_i32 = arith.constant 0 : i32
    %c0_i32_0 = arith.constant 0 : i32
    %c0_i32_1 = arith.constant 0 : i32
    return %c0_i32, %c0_i32_0 : i32, i32
  }
  func.func @transform_6(%arg0: i32) -> (i32, i32) {
    %c0_i32 = arith.constant 0 : i32
    %c0_i32_0 = arith.constant 0 : i32
    %c0_i32_1 = arith.constant 0 : i32
    return %c0_i32, %c0_i32_0 : i32, i32
  }
  func.func @transform_7(%arg0: i32) -> (i32, i32, i32) {
    %c0_i32 = arith.constant 0 : i32
    %c0_i32_0 = arith.constant 0 : i32
    %c0_i32_1 = arith.constant 0 : i32
    %c0_i32_2 = arith.constant 0 : i32
    return %c0_i32, %c0_i32_0, %c0_i32_1 : i32, i32, i32
  }
  func.func @transform_8(%arg0: i32) -> (i32, i32) {
    %c0_i32 = arith.constant 0 : i32
    %c0_i32_0 = arith.constant 0 : i32
    %c0_i32_1 = arith.constant 0 : i32
    return %c0_i32, %c0_i32_0 : i32, i32
  }
  func.func @transform_9(%arg0: i32) -> (i32, i32) {
    %c0_i32 = arith.constant 0 : i32
    %c0_i32_0 = arith.constant 0 : i32
    %c0_i32_1 = arith.constant 0 : i32
    return %c0_i32, %c0_i32_0 : i32, i32
  }
  func.func @transform_10(%arg0: i32) -> (i32, i32) {
    %c0_i32 = arith.constant 0 : i32
    %c0_i32_0 = arith.constant 0 : i32
    %c0_i32_1 = arith.constant 0 : i32
    return %c0_i32, %c0_i32_0 : i32, i32
  }
  func.func @transform_11(%arg0: i32) -> (i32, i32, i32) {
    %c0_i32 = arith.constant 0 : i32
    %c0_i32_0 = arith.constant 0 : i32
    %c0_i32_1 = arith.constant 0 : i32
    return %arg0, %c0_i32, %c0_i32_0 : i32, i32, i32
  }
}

</mosaic_0001>

<bundles_post_ra>
// kernel: up_forward.1
= control target key start
LH: loop header
LB: loop body
LE: loop exit
PB: predicated region body
PF: predicated region fallthrough
CT: control target
= control target key end

     0   :  { %s3476_s17 = smov 0   ;;  %s4010_s0 = inlined_call_operand.vmem [shape: f32[2,4,64], index: 0, kind: input, shape index: {}]   ;;  %s4011_s1 = inlined_call_operand.vmem [shape: f32[2,4,512], index: 1, kind: input, shape index: {}]   ;;  %s4012_s2 = inlined_call_operand.vmem [shape: f32[64,256], index: 2, kind: input, shape index: {}]   ;;  %s4013_s3 = inlined_call_operand.vmem [shape: f32[9,4,4], index: 3, kind: input, shape index: {}]   ;;  %s4014_s4 = inlined_call_operand.vmem [shape: f32[9,4,4], index: 4, kind: input, shape index: {}]   ;;  %s4015_s5 = inlined_call_operand.vmem [shape: f32[4,1], index: 5, kind: input, shape index: {}]   ;;  %s4016_s6 = inlined_call_operand.vmem [shape: f32[4,1], index: 6, kind: input, shape index: {}]   ;;  %s4017_s7 = inlined_call_operand.vmem [shape: f32[9,4,4], index: 7, kind: input, shape index: {}]   ;;  %s4018_s8 = inlined_call_operand.vmem [shape: f32[4,1], index: 8, kind: input, shape index: {}]   ;;  %s4019_s9 = inlined_call_operand.vmem [shape: f32[4,1], index: 9, kind: input, shape index: {}]   ;;  %s4020_s10 = inlined_call_operand.vmem [shape: f32[3,256], index: 10, kind: input, shape index: {}]   ;;  %s4021_s11 = inlined_call_operand.vmem [shape: f32[2,4,256], index: 11, kind: output, shape index: {}]  }
   0x1 LB: > { %s3186_s18 = sadd.s32 4294967295, %s3404_s17   ;;  %p3190_p0 = scmp.ge.s32.totalorder %s3404_s17, 1  ;;  %s3404_s17 = sphi %s3476_s17, %s21_s17  }
   0x2   : > { %p346_p1 = scmp.lt.s32.totalorder %s3404_s17, 3 }
   0x4   : > { %p347_p2 = pnand %p3190_p0, %p346_p1 }
   0x5   : > { %v406_v0 = vld [vmem:[%s4012_s2 + $0x8] sm:$0xff] (!%p347_p2)  ;;  %v408_v1 = vld [vmem:[%s4012_s2 + $0x18] sm:$0xff] (!%p347_p2)  ;;  %v405_v2 = vld [vmem:[%s4012_s2] sm:$0xff] (!%p347_p2)  ;;  %v509_v3 = vlaneseq (!%p347_p2)  ;;  %v3406_v8 = vmov (!%p347_p2), 0.0   ;;  %p3519_p3 = scmp.lt.s32.totalorder (!%p347_p2), %s3186_s18, 1  ;;  %s3407_s24 = smov (!%p347_p2), 113  }
   0x6   : > { %350 = sbr.rel (%p347_p2) target bundleno = 1169 (0x491), region = 64  ;;  %v3306_v4 = vpack.c.bf16 (!%p347_p2), %v408_v1, %v406_v0  ;;  %v407_v5 = vld [vmem:[%s4012_s2 + $0x10] sm:$0xff] (!%p347_p2)  ;;  %v410_v6 = vld [vmem:[%s4012_s2 + $0x28] sm:$0xff] (!%p347_p2)  ;;  %v412_v7 = vld [vmem:[%s4012_s2 + $0x38] sm:$0xff] (!%p347_p2)  ;;  %489 = vmatprep.mubr.f32.mxu0 (!%p347_p2), %v3406_v8  ;;  %496 = vst [vmem:[#allocation2] sm:$0xff] (!%p347_p2), %v3406_v8  ;;  %809 = vmatprep.mubr.f32.mxu1 (!%p347_p2), %v3406_v8  ;;  %vm421_vm0 = vcmask (!%p347_p2), 523264  }
   0x7   : > { %497 = vst [vmem:[#allocation2 + $0x8] sm:$0xff] (!%p347_p2), %v3406_v8  ;;  %2259 = vst [vmem:[#allocation3] sm:$0xff] (!%p347_p2), %v3406_v8  ;;  %v3308_v9 = vpack.c.bf16 (!%p347_p2), %v407_v5, %v405_v2  ;;  %v3310_v10 = vpack.c.bf16 (!%p347_p2), %v412_v7, %v410_v6  ;;  %v409_v11 = vld [vmem:[%s4012_s2 + $0x20] sm:$0xff] (!%p347_p2)  ;;  %v411_v12 = vld [vmem:[%s4012_s2 + $0x30] sm:$0xff] (!%p347_p2)  ;;  %v510_v14 = vshrl.u32 (!%p347_p2), %v509_v3, 7  ;;  %s3408_s25 = smov (!%p347_p2), 127  }
   0x8   : > { %2260 = vst [vmem:[#allocation3 + $0x8] sm:$0xff] (!%p347_p2), %v3406_v8  ;;  %v414_v13 = vld [vmem:[%s4012_s2 + $0x48] sm:$0xff] (!%p347_p2)  ;;  %3307 = vmatprep.subr.bf16.mxu0 (!%p347_p2), %v3306_v4  ;;  %v416_v15 = vld [vmem:[%s4012_s2 + $0x58] sm:$0xff] (!%p347_p2)  ;;  %v3312_v16 = vpack.c.bf16 (!%p347_p2), %v411_v12, %v409_v11  ;;  %v413_v17 = vld [vmem:[%s4012_s2 + $0x40] sm:$0xff] (!%p347_p2)  ;;  %s3409_s30 = smov (!%p347_p2), 16   ;;  %vm735_vm1 = vcmask (!%p347_p2), 130048  }
   0x9   : > { %3309 = vmatpush1.bf16.msra.mxu0 (!%p347_p2), %v3308_v9  ;;  %v913_v18 = vsub.s32 (!%p347_p2), 2, %v510_v14  ;;  %v3314_v19 = vpack.c.bf16 (!%p347_p2), %v416_v15, %v414_v13  ;;  %v415_v20 = vld [vmem:[%s4012_s2 + $0x50] sm:$0xff] (!%p347_p2)  ;;  %v507_v21 = vld [vmem:[%s4020_s10] sm:$0x77] (!%p347_p2)  ;;  %v917_v22 = vsub.s32 (!%p347_p2), 6, %v510_v14  ;;  %v511_v23 = vsub.s32 (!%p347_p2), 0, %v510_v14 }
   0xa   : > { %3311 = vmatprep.subr.bf16.mxu0 (!%p347_p2), %v3310_v10  ;;  %v515_v24 = vsub.s32 (!%p347_p2), 4, %v510_v14  ;;  %v418_v25 = vld [vmem:[%s4012_s2 + $0x68] sm:$0xff] (!%p347_p2)  ;;  %v420_v26 = vld [vmem:[%s4012_s2 + $0x78] sm:$0xff] (!%p347_p2)  ;;  %v3316_v31 = vpack.c.bf16 (!%p347_p2), %v415_v20, %v413_v17  ;;  %v417_v34 = vld [vmem:[%s4012_s2 + $0x60] sm:$0xff] (!%p347_p2)  ;;  %vm559_vm2 = vcmask (!%p347_p2), 1043456   ;;  %vm555_vm3 = vcmask (!%p347_p2), 31744  }
   0xb   : > { %v914_v27 = vrot.slane (!%p347_p2), %v507_v21, %v913_v18  ;;  %v918_v28 = vrot.slane (!%p347_p2), %v507_v21, %v917_v22  ;;  %v512_v29 = vrot.slane (!%p347_p2), %v507_v21, %v511_v23  ;;  %v3318_v33 = vpack.c.bf16 (!%p347_p2), %v420_v26, %v418_v25  ;;  %v419_v35 = vld [vmem:[%s4012_s2 + $0x70] sm:$0xff] (!%p347_p2)  ;;  %v3203_v53 = vld [vmem:[%s4013_s3 + $0x4] sm:$0xf] (!%p347_p2)  ;;  %s3410_s14 = smov (!%p347_p2), 15   ;;  %s3411_s15 = smov (!%p347_p2), 1  }
   0xc   : > { %v516_v30 = vrot.slane (!%p347_p2), %v507_v21, %v515_v24  ;;  %v3320_v40 = vpack.c.bf16 (!%p347_p2), %v419_v35, %v417_v34  ;;  %vm935_vm4 = vcmask (!%p347_p2), 924672   ;;  %vm1133_vm5 = vcmask (!%p347_p2), 1039360   ;;  %s3412_s16 = smov (!%p347_p2), 111   ;;  %s3413_s19 = smov (!%p347_p2), 112   ;;  %v3207_v20 = vld [vmem:[%s4014_s4 + $0x4] sm:$0xf] (!%p347_p2) }
   0xd   : > { %s4024_s18 = smov (!%p3519_p3, %s3186_s18), 1  ;;  %3313 = vmatpush1.bf16.msra.mxu0 %v3312_v16  ;;  %v924_v32 = vrot.slane %v914_v27, %v913_v18  ;;  %v928_v36 = vrot.slane %v918_v28, %v913_v18  ;;  %v522_v37 = vrot.slane %v512_v29, %v511_v23  ;;  %vm954_vm6 = vcmask 121856   ;;  %v3211_v28 = vld [vmem:[%s4013_s3 + $0x8] sm:$0xf]  ;;  %s3414_s12 = smov 17  }
   0xe   : > { %3315 = vmatprep.subr.bf16.mxu0 %v3314_v19  ;;  %v526_v38 = vrot.slane %v516_v30, %v511_v23  ;;  %s3191_s20 = sshll.u32 %s4024_s18, 2  ;;  %s3304_s26 = sshll.u32 %s4024_s18, 4  ;;  %vm1152_vm7 = vcmask 7168   ;;  %v3215_v35 = vld [vmem:[%s4014_s4 + $0x8] sm:$0xf]  ;;  %vm533_vm8 = vcmask 908288  }
   0xf   : > { %v3554_v39 = vcombine.low %v924_v32, %v928_v36  ;;  %s393_s23 = scalar_lea.vmem %s4010_s0, %s3191_s20  ;;  %s398_s29 = scalar_lea.vmem %s4011_s1, %s3304_s26  ;;  %vm1879_vm9 = vcmask 916480   ;;  %vm552_vm10 = vcmask 138240  }
  0x10   : > { %v3561_v41 = vcombine.low %v522_v37, %v526_v38  ;;  %v404_v42 = vld [vmem:[%s393_s23] sm:$0xf]  ;;  %v3580_v45 = vld [vmem:[%s398_s29 + $0x8] sm:$0xff] }
  0x11   : > { %3317 = vmatpush1.bf16.msra.mxu0 %v3316_v31  ;;  %932 = vrot.lane.b32.xlu0 %v3554_v39, %s3407_s24  ;;  %v3570_v43 = vld [vmem:[%s398_s29] sm:$0xff]  ;;  %v1872_v13 = vcombine.high %v3580_v45, %v3580_v45 }
  0x12   : > { %3319 = vmatprep.subr.bf16.mxu0 %v3318_v33  ;;  %v3574_v44 = vcombine.high %v3570_v43, %v3570_v43 }
  0x14   : > { %731 = vrot.lane.b32.xlu1 %v3574_v44, %s3409_s30 }
  0x15   : > { %3321 = vmatpush1.bf16.msra.mxu0 %v3320_v40  ;;  %1130 = vrot.lane.b32.xlu0 %v3561_v41, %s3408_s25 }
  0x18   : > { %3196 = vmatmul.mubr.msk.f32.vlgmr.msra.gmra.mrb[0].mxu0 %vm421_vm0, %v404_v42  ;;  %733 = vrot.lane.b32.xlu1 %v3580_v45, %s3409_s30 }
  0x19   : > { %628 = vmatprep.mubr.f32.mxu0 %v3406_v8  ;;  %729 = vrot.lane.b32.xlu0 %v3570_v43, %s3409_s30 }
  0x83   : > { %v933_v46 = vpop.permute.xlu0 %932 }
  0x84   : > { %v3593_v57 = vrot.slane %v933_v46, 4 }
  0x86   : > { %v732_v48 = vpop.permute.xlu1 %731  ;;  %v3597_v58 = vsel %vm935_vm4, %v3593_v57, %v933_v46  ;;  %v940_v2 = vmul.f32 %v3593_v57, %v3580_v45 }
  0x87   : > { %v1131_v47 = vpop.permute.xlu0 %1130  ;;  %v939_v59 = vmul.f32 %v3597_v58, %v3570_v43 }
  0x88   : > { %v3614_v0 = vrot.slane %v1131_v47, 4 }
  0x89   : > { %v947_v63 = vcombine.high %v939_v59, %v939_v59 }
  0x8a   : > { %v734_v50 = vpop.permute.xlu1 %733  ;;  %v3625_v3 = vsel %vm1133_vm5, %v3614_v0, %v1131_v47  ;;  %v1138_v10 = vmul.f32 %v3614_v0, %v3580_v45 }
  0x8b   : > { %v730_v49 = vpop.permute.xlu0 %729  ;;  %v737_v52 = vsel %vm735_vm1, %v732_v48, %v734_v50  ;;  %v1137_v4 = vmul.f32 %v3625_v3, %v3570_v43 }
  0x8c   : > { %v736_v51 = vsel %vm735_vm1, %v730_v49, %v732_v48  ;;  %3204 = vmatprep.subr.msk.mxu1 %vm559_vm2, %v737_v52  ;;  %v3219_v49 = vld [vmem:[%s4013_s3 + $0xc] sm:$0xf] }
  0x8d   : > { %3205 = vmatpush1.msk.msra.mxu1 %vm559_vm2, %v736_v51  ;;  %v1145_v7 = vcombine.high %v1137_v4, %v1137_v4 }
  0x8e   : > { %3206 = vmatmul.mubr.msk.f32.vlgmr.msra.gmra.mrb[0].mxu1 %vm555_vm3, %v3203_v53 }
  0x8f   : > { %902 = vmatprep.mubr.f32.mxu1 %v3406_v8 }
  0xeb   : > { %v491_v54 = vpop.f32.mrb[0].mxu0 }
  0xec   : > { %v493_v55 = vpop.f32.mrb[1].mxu0 }
  0xed   : > { %v500_v56 = vcombine.low %v491_v54, %v493_v55 }
  0xef   : > { %502 = vst [vmem:[#allocation2 + $0x4] sm:$0xff] %v500_v56 }
  0xf6   : > { %v3601_v60 = vld [vmem:[#allocation2] sm:$0xff]  ;;  %v3603_v61 = vld [vmem:[#allocation2 + $0x8] sm:$0xff] }
  0xf7   : > { %827 = vrot.lane.b32.xlu0 %v3603_v61, %s3409_s30  ;;  %v3609_v62 = vcombine.high %v3601_v60, %v3601_v60  ;;  %v941_v1 = vmul.f32 %v3597_v58, %v3601_v60  ;;  %v942_v5 = vmul.f32 %v3593_v57, %v3603_v61  ;;  %v1139_v9 = vmul.f32 %v3625_v3, %v3601_v60 }
  0xf8   : > { %v1140_v11 = vmul.f32 %v3614_v0, %v3603_v61  ;;  %v1964_v14 = vcombine.high %v3603_v61, %v3603_v61 }
  0xf9   : > { %825 = vrot.lane.b32.xlu1 %v3609_v62, %s3409_s30  ;;  %v1041_v6 = vcombine.high %v941_v1, %v941_v1  ;;  %v1239_v12 = vcombine.high %v1139_v9, %v1139_v9 }
  0xfb   : > { %950 = vrot.lane.b32.xlu0 %v947_v63, %s3410_s14 }
  0xfd   : > { %823 = vrot.lane.b32.xlu1 %v3601_v60, %s3409_s30 }
  0xff   : > { %948 = vrot.lane.b32.xlu0 %v939_v59, %s3410_s14 }
 0x101   : > { %952 = vrot.lane.b32.xlu1 %v940_v2, %s3410_s14 }
 0x103   : > { %1046 = vrot.lane.b32.xlu0 %v942_v5, %s3410_s14 }
 0x105   : > { %1044 = vrot.lane.b32.xlu1 %v1041_v6, %s3410_s14 }
 0x107   : > { %1148 = vrot.lane.b32.xlu0 %v1145_v7, %s3411_s15  ;;  %v3415_v7 = vmov 0  }
 0x108   : > { %3390 = vset.pattern.permute.xlu1 %v3415_v7  ;;  %3391 = vset.pattern.permute.xlu0 %v3415_v7  ;;  %v3259_v7 = vld [vmem:[%s4013_s3 + $0x20] sm:$0xf] }
 0x109   : > { %1042 = vrot.lane.b32.xlu1 %v941_v1, %s3410_s14 }
 0x10b   : > { %1146 = vrot.lane.b32.xlu0 %v1137_v4, %s3411_s15  ;;  %v3223_v4 = vld [vmem:[%s4014_s4 + $0xc] sm:$0xf] }
 0x10d   : > { %1150 = vrot.lane.b32.xlu1 %v1138_v10, %s3411_s15 }
 0x10f   : > { %1244 = vrot.lane.b32.xlu0 %v1140_v11, %s3411_s15 }
 0x111   : > { %1242 = vrot.lane.b32.xlu1 %v1239_v12, %s3411_s15 }
 0x113   : > { %530 = vrot.lane.b32.xlu0 %v3561_v41, %s3412_s16 }
 0x115   : > { %1240 = vrot.lane.b32.xlu1 %v1139_v9, %s3411_s15 }
 0x117   : > { %1494 = vrot.lane.b32.xlu0 %v3580_v45, %s3408_s25 }
 0x119   : > { %1492 = vrot.lane.b32.xlu1 %v3570_v43, %s3408_s25 }
 0x11b   : > { %1505 = vrot.lane.b32.xlu0 %v3603_v61, %s3408_s25 }
 0x11d   : > { %1503 = vrot.lane.b32.xlu1 %v3601_v60, %s3408_s25 }
 0x11f   : > { %1683 = vrot.lane.b32.xlu0 %v3580_v45, %s3407_s24 }
 0x121   : > { %1681 = vrot.lane.b32.xlu1 %v3570_v43, %s3407_s24 }
 0x123   : > { %1694 = vrot.lane.b32.xlu0 %v3603_v61, %s3407_s24 }
 0x125   : > { %1692 = vrot.lane.b32.xlu1 %v3601_v60, %s3407_s24 }
 0x127   : > { %1877 = vrot.lane.b32.xlu0 %v1872_v13, %s3413_s19  ;;  %v2249_v13 = vld [vmem:[%s4016_s6] sm:$0xf] }
 0x129   : > { %1875 = vrot.lane.b32.xlu1 %v3580_v45, %s3413_s19 }
 0x12b   : > { %1967 = vrot.lane.b32.xlu0 %v3603_v61, %s3413_s19 }
 0x12d   : > { %1873 = vrot.lane.b32.xlu1 %v3574_v44, %s3413_s19 }
 0x12f   : > { %1965 = vrot.lane.b32.xlu0 %v3609_v62, %s3413_s19 }
 0x131   : > { %1969 = vrot.lane.b32.xlu1 %v1964_v14, %s3413_s19 }
 0x133   : > { %2055 = vrot.lane.b32.xlu0 %v3580_v45, %s3412_s16 }
 0x135   : > { %2053 = vrot.lane.b32.xlu1 %v3570_v43, %s3412_s16 }
 0x169   : > { %v828_v15 = vpop.permute.xlu0 %827 }
 0x16b   : > { %v826_v16 = vpop.permute.xlu1 %825 }
 0x16c   : > { %v830_v17 = vsel %vm735_vm1, %v826_v16, %v828_v15 }
 0x16d   : > { %v951_v18 = vpop.permute.xlu0 %950  ;;  %3208 = vmatprep.subr.msk.mxu1 %vm559_vm2, %v830_v17 }
 0x16f   : > { %v824_v19 = vpop.permute.xlu1 %823 }
 0x170   : > { %v829_v21 = vsel %vm735_vm1, %v824_v19, %v826_v16 }
 0x171   : > { %v949_v22 = vpop.permute.xlu0 %948  ;;  %3209 = vmatpush1.msk.msra.mxu1 %vm559_vm2, %v829_v21 }
 0x172   : > { %3210 = vmatmul.mubr.msk.f32.vlgmr.msra.gmra.mrb[0].mxu1 %vm555_vm3, %v3207_v20  ;;  %v955_v25 = vsel %vm954_vm6, %v949_v22, %v951_v18  ;;  %v3231_v22 = vld [vmem:[%s4014_s4 + $0x10] sm:$0xf] }
 0x173   : > { %v953_v23 = vpop.permute.xlu1 %952  ;;  %1028 = vmatprep.mubr.f32.mxu1 %v3406_v8 }
 0x174   : > { %v956_v24 = vsel %vm954_vm6, %v951_v18, %v953_v23 }
 0x175   : > { %v1047_v26 = vpop.permute.xlu0 %1046  ;;  %3212 = vmatprep.subr.msk.mxu1 %vm559_vm2, %v956_v24 }
 0x176   : > { %3213 = vmatpush1.msk.msra.mxu1 %vm559_vm2, %v955_v25 }
 0x177   : > { %v1045_v27 = vpop.permute.xlu1 %1044 }
 0x178   : > { %v1049_v29 = vsel %vm954_vm6, %v1045_v27, %v1047_v26 }
 0x179   : > { %v1149_v30 = vpop.permute.xlu0 %1148  ;;  %3216 = vmatprep.subr.msk.mxu1 %vm559_vm2, %v1049_v29 }
 0x17a   : > { %3214 = vmatmul.mubr.msk.f32.vlgmr.msra.gmra.mrb[0].mxu1 %vm555_vm3, %v3211_v28 }
 0x17b   : > { %v1043_v31 = vpop.permute.xlu1 %1042  ;;  %1121 = vmatprep.mubr.f32.mxu1 %v3406_v8 }
 0x17c   : > { %v1048_v32 = vsel %vm954_vm6, %v1043_v31, %v1045_v27  ;;  %v3235_v31 = vld [vmem:[%s4013_s3 + $0x14] sm:$0xf] }
 0x17d   : > { %v1147_v33 = vpop.permute.xlu0 %1146  ;;  %3217 = vmatpush1.msk.msra.mxu1 %vm559_vm2, %v1048_v32 }
 0x17e   : > { %v1153_v38 = vsel %vm1152_vm7, %v1147_v33, %v1149_v30 }
 0x17f   : > { %v1151_v34 = vpop.permute.xlu1 %1150 }
 0x180   : > { %v1154_v36 = vsel %vm1152_vm7, %v1149_v30, %v1151_v34 }
 0x181   : > { %v1245_v37 = vpop.permute.xlu0 %1244  ;;  %3220 = vmatprep.subr.msk.mxu1 %vm559_vm2, %v1154_v36 }
 0x182   : > { %3218 = vmatmul.mubr.msk.f32.vlgmr.msra.gmra.mrb[0].mxu1 %vm555_vm3, %v3215_v35 }
 0x183   : > { %3221 = vmatpush1.msk.msra.mxu1 %vm559_vm2, %v1153_v38  ;;  %v1243_v40 = vpop.permute.xlu1 %1242  ;;  %1226 = vmatprep.mubr.f32.mxu1 %v3406_v8  ;;  %v3239_v38 = vld [vmem:[%s4014_s4 + $0x14] sm:$0xf] }
 0x184   : > { %v1247_v42 = vsel %vm1152_vm7, %v1243_v40, %v1245_v37 }
 0x185   : > { %v531_v46 = vpop.permute.xlu0 %530  ;;  %3224 = vmatprep.subr.msk.mxu1 %vm559_vm2, %v1247_v42 }
 0x186   : > { %v3716_v47 = vrot.slane %v531_v46, 4 }
 0x187   : > { %v1241_v48 = vpop.permute.xlu1 %1240 }
 0x188   : > { %v3723_v50 = vsel %vm533_vm8, %v3716_v47, %v531_v46  ;;  %v1246_v51 = vsel %vm1152_vm7, %v1241_v48, %v1243_v40  ;;  %v540_v52 = vmul.f32 %v3716_v47, %v3603_v61  ;;  %v538_v11 = vmul.f32 %v3716_v47, %v3580_v45  ;;  %v3243_v48 = vld [vmem:[%s4013_s3 + $0x18] sm:$0xf] }
 0x189   : > { %v1495_v53 = vpop.permute.xlu0 %1494  ;;  %v539_v54 = vmul.f32 %v3723_v50, %v3601_v60  ;;  %v537_v59 = vmul.f32 %v3723_v50, %v3570_v43 }
 0x18a   : > { %v1497_v55 = vrot.slane %v1495_v53, 4  ;;  %550 = vrot.lane.b32.xlu0 %v540_v52, %s3414_s12  ;;  %3222 = vmatmul.mubr.msk.f32.vlgmr.msra.gmra.mrb[0].mxu1 %vm555_vm3, %v3219_v49 }
 0x18b   : > { %3225 = vmatpush1.msk.msra.mxu1 %vm559_vm2, %v1246_v51  ;;  %v1493_v56 = vpop.permute.xlu1 %1492  ;;  %546 = vrot.lane.b32.xlu1 %v539_v54, %s3414_s12  ;;  %v545_v1 = vcombine.high %v539_v54, %v539_v54  ;;  %v637_v5 = vcombine.high %v537_v59, %v537_v59 }
 0x18c   : > { %v1496_v63 = vrot.slane %v1493_v56, 4  ;;  %1319 = vmatprep.mubr.f32.mxu1 %v3406_v8  ;;  %3228 = vmatprep.subr.msk.mxu1 %vm559_vm2, %v3580_v45  ;;  %v2241_v45 = vld [vmem:[%s4015_s5] sm:$0xf]  ;;  %v3247_v56 = vld [vmem:[%s4014_s4 + $0x18] sm:$0xf] }
 0x18d   : > { %v1506_v9 = vpop.permute.xlu0 %1505 }
 0x18e   : > { %v1498_v2 = vsel %vm559_vm2, %v1496_v63, %v1497_v55  ;;  %2063 = vrot.lane.b32.xlu0 %v3601_v60, %s3412_s16  ;;  %v1508_v12 = vrot.slane %v1506_v9, 4 }
 0x18f   : > { %548 = vrot.lane.b32.xlu1 %v545_v1, %s3414_s12  ;;  %v1499_v43 = vsel %vm1133_vm5, %v1498_v2, %v1495_v53  ;;  %v1504_v6 = vpop.permute.xlu1 %1503 }
 0x190   : > { %v1502_v60 = vmul.f32 %v1499_v43, %v3554_v39  ;;  %v1507_v10 = vrot.slane %v1504_v6, 4  ;;  %v3255_v6 = vld [vmem:[%s4014_s4 + $0x1c] sm:$0xf] }
 0x191   : > { %v1684_v15 = vpop.permute.xlu0 %1683 }
 0x192   : > { %640 = vrot.lane.b32.xlu0 %v637_v5, %s3414_s12  ;;  %3226 = vmatmul.mubr.msk.f32.vlgmr.msra.gmra.mrb[0].mxu1 %vm555_vm3, %v3223_v4  ;;  %v1516_v14 = vcombine.high %v1502_v60, %v1502_v60  ;;  %v1686_v17 = vrot.slane %v1684_v15, 4  ;;  %v3251_v4 = vld [vmem:[%s4013_s3 + $0x1c] sm:$0xf] }
 0x193   : > { %3229 = vmatpush1.msk.msra.mxu1 %vm559_vm2, %v3574_v44  ;;  %2065 = vrot.lane.b32.xlu1 %v3603_v61, %s3412_s16  ;;  %v3227_v44 = vld [vmem:[%s4013_s3 + $0x10] sm:$0xf]  ;;  %v1682_v16 = vpop.permute.xlu1 %1681 }
 0x194   : > { %3232 = vmatprep.subr.msk.mxu1 %vm559_vm2, %v3603_v61  ;;  %1401 = vmatprep.mubr.f32.mxu1 %v3406_v8  ;;  %v1509_v61 = vsel %vm559_vm2, %v1507_v10, %v1508_v12  ;;  %v1685_v18 = vrot.slane %v1682_v16, 4 }
 0x195   : > { %v1510_v19 = vsel %vm1133_vm5, %v1509_v61, %v1506_v9  ;;  %v1695_v24 = vpop.permute.xlu0 %1694 }
 0x196   : > { %638 = vrot.lane.b32.xlu0 %v537_v59, %s3414_s12  ;;  %v1512_v20 = vmul.f32 %v1510_v19, %v3554_v39  ;;  %v1687_v21 = vsel %vm559_vm2, %v1685_v18, %v1686_v17  ;;  %v1697_v28 = vrot.slane %v1695_v24, 4 }
 0x197   : > { %642 = vrot.lane.b32.xlu1 %v538_v11, %s3414_s12  ;;  %v1688_v23 = vsel %vm935_vm4, %v1687_v21, %v1684_v15  ;;  %v1693_v25 = vpop.permute.xlu1 %1692 }
 0x198   : > { %v1691_v26 = vmul.f32 %v1688_v23, %v3561_v41  ;;  %v1696_v27 = vrot.slane %v1693_v25, 4  ;;  %v3263_v25 = vld [vmem:[%s4014_s4 + $0x20] sm:$0xf] }
 0x199   : > { %v1878_v29 = vpop.permute.xlu0 %1877 }
 0x19a   : > { %3230 = vmatmul.mubr.msk.f32.vlgmr.msra.gmra.mrb[0].mxu1 %vm555_vm3, %v3227_v44  ;;  %2252 = vperm.xlu0 %3391, %v2249_v13   ;;  %v1698_v32 = vsel %vm559_vm2, %v1696_v27, %v1697_v28  ;;  %v1705_v33 = vcombine.high %v1691_v26, %v1691_v26  ;;  %v542_v13 = vld [vmem:[%s4014_s4] sm:$0xf] }
 0x19b   : > { %3233 = vmatpush1.msk.msra.mxu1 %vm559_vm2, %v3609_v62  ;;  %1483 = vmatprep.mubr.f32.mxu1 %v3406_v8  ;;  %v1600_v62 = vcombine.high %v1512_v20, %v1512_v20  ;;  %v1876_v30 = vpop.permute.xlu1 %1875  ;;  %v1699_v34 = vsel %vm935_vm4, %v1698_v32, %v1695_v24 }
 0x19c   : > { %3236 = vmatprep.subr.msk.mxu1 %vm559_vm2, %v1516_v14  ;;  %2244 = vperm.xlu1 %3390, %v2241_v45   ;;  %v1701_v37 = vmul.f32 %v1699_v34, %v3561_v41  ;;  %v1881_v52 = vsel %vm1879_vm9, %v1876_v30, %v1878_v29 }
 0x19d   : > { %v1968_v35 = vpop.permute.xlu0 %1967 }
 0x19e   : > { %v1789_v40 = vcombine.high %v1701_v37, %v1701_v37 }
 0x19f   : > { %v1874_v36 = vpop.permute.xlu1 %1873 }
 0x1a0   : > { %v1880_v59 = vsel %vm1879_vm9, %v1874_v36, %v1876_v30 }
 0x1a1   : > { %v1966_v42 = vpop.permute.xlu0 %1965 }
 0x1a2   : > { %3234 = vmatmul.mubr.msk.f32.vlgmr.msra.gmra.mrb[0].mxu1 %vm555_vm3, %v3231_v22  ;;  %v1971_v43 = vsel %vm1879_vm9, %v1966_v42, %v1968_v35  ;;  %v541_v22 = vld [vmem:[%s4013_s3] sm:$0xf] }
 0x1a3   : > { %3237 = vmatpush1.msk.msra.mxu1 %vm559_vm2, %v1502_v60  ;;  %1588 = vmatprep.mubr.f32.mxu1 %v3406_v8  ;;  %v1970_v46 = vpop.permute.xlu1 %1969 }
 0x1a4   : > { %3240 = vmatprep.subr.msk.mxu1 %vm559_vm2, %v1600_v62  ;;  %v1972_v1 = vsel %vm1879_vm9, %v1968_v35, %v1970_v46 }
 0x1a5   : > { %v2056_v49 = vpop.permute.xlu0 %2055 }
 0x1a6   : > { %v2058_v53 = vrot.slane %v2056_v49, 4 }
 0x1a7   : > { %v2054_v51 = vpop.permute.xlu1 %2053 }
 0x1a8   : > { %v2057_v54 = vrot.slane %v2054_v51, 4 }
 0x1aa   : > { %3238 = vmatmul.mubr.msk.f32.vlgmr.msra.gmra.mrb[0].mxu1 %vm555_vm3, %v3235_v31  ;;  %v2059_v55 = vsel %vm559_vm2, %v2057_v54, %v2058_v53 }
 0x1ab   : > { %3241 = vmatpush1.msk.msra.mxu1 %vm559_vm2, %v1512_v20  ;;  %1672 = vmatprep.mubr.f32.mxu1 %v3406_v8  ;;  %v2060_v63 = vsel %vm533_vm8, %v2059_v55, %v2056_v49 }
 0x1ac   : > { %3244 = vmatprep.subr.msk.mxu1 %vm559_vm2, %v1705_v33  ;;  %v2062_v2 = vmul.f32 %v2060_v63, %v3554_v39 }
 0x1ae   : > { %v2076_v5 = vcombine.high %v2062_v2, %v2062_v2 }
 0x1b2   : > { %3242 = vmatmul.mubr.msk.f32.vlgmr.msra.gmra.mrb[0].mxu1 %vm555_vm3, %v3239_v38 }
 0x1b3   : > { %3245 = vmatpush1.msk.msra.mxu1 %vm559_vm2, %v1691_v26  ;;  %1777 = vmatprep.mubr.f32.mxu1 %v3406_v8 }
 0x1b4   : > { %3248 = vmatprep.subr.msk.mxu1 %vm559_vm2, %v1789_v40 }
 0x1ba   : > { %3246 = vmatmul.mubr.msk.f32.vlgmr.msra.gmra.mrb[0].mxu1 %vm555_vm3, %v3243_v48 }
 0x1bb   : > { %3249 = vmatpush1.msk.msra.mxu1 %vm559_vm2, %v1701_v37  ;;  %1861 = vmatprep.mubr.f32.mxu1 %v3406_v8 }
 0x1bc   : > { %3252 = vmatprep.subr.msk.mxu1 %vm559_vm2, %v1881_v52 }
 0x1c2   : > { %3250 = vmatmul.mubr.msk.f32.vlgmr.msra.gmra.mrb[0].mxu1 %vm555_vm3, %v3247_v56 }
 0x1c3   : > { %3253 = vmatpush1.msk.msra.mxu1 %vm559_vm2, %v1880_v59  ;;  %1953 = vmatprep.mubr.f32.mxu1 %v3406_v8 }
 0x1c4   : > { %3256 = vmatprep.subr.msk.mxu1 %vm559_vm2, %v1972_v1 }
 0x1ca   : > { %3254 = vmatmul.mubr.msk.f32.vlgmr.msra.gmra.mrb[0].mxu1 %vm555_vm3, %v3251_v4  ;;  %v3267_v4 = vld [vmem:[%s4017_s7 + $0x4] sm:$0xf] }
 0x1cb   : > { %3257 = vmatpush1.msk.msra.mxu1 %vm559_vm2, %v1971_v43  ;;  %2044 = vmatprep.mubr.f32.mxu1 %v3406_v8 }
 0x1cc   : > { %3260 = vmatprep.subr.msk.mxu1 %vm559_vm2, %v2076_v5 }
 0x1d2   : > { %3258 = vmatmul.mubr.msk.f32.vlgmr.msra.gmra.mrb[0].mxu1 %vm555_vm3, %v3255_v6 }
 0x1d3   : > { %3261 = vmatpush1.msk.msra.mxu1 %vm559_vm2, %v2062_v2  ;;  %2148 = vmatprep.mubr.f32.mxu1 %v3406_v8 }
 0x1da   : > { %3262 = vmatmul.mubr.msk.f32.vlgmr.msra.gmra.mrb[0].mxu1 %vm555_vm3, %v3259_v7 }
 0x1db   : > { %2232 = vmatprep.mubr.f32.mxu1 %v3406_v8 }
 0x1fc   : > { %v551_v9 = vpop.permute.xlu0 %550 }
 0x1fd   : > { %v547_v60 = vpop.permute.xlu1 %546 }
 0x200   : > { %v2064_v10 = vpop.permute.xlu0 %2063 }
 0x201   : > { %v549_v11 = vpop.permute.xlu1 %548  ;;  %v2067_v15 = vrot.slane %v2064_v10, 4 }
 0x202   : > { %v553_v12 = vsel %vm552_vm10, %v547_v60, %v549_v11  ;;  %v554_v44 = vsel %vm552_vm10, %v549_v11, %v551_v9  ;;  %v2270_v11 = vld [vmem:[%s4017_s7] sm:$0xf] }
 0x203   : > { %3197 = vmatprep.subr.msk.mxu0 %vm559_vm2, %v554_v44 }
 0x204   : > { %v641_v61 = vpop.permute.xlu0 %640  ;;  %3198 = vmatpush1.msk.msra.mxu0 %vm559_vm2, %v553_v12 }
 0x205   : > { %3199 = vmatmul.mubr.msk.f32.vlgmr.msra.gmra.mrb[2].mxu0 %vm555_vm3, %v542_v13  ;;  %v2066_v14 = vpop.permute.xlu1 %2065 }
 0x206   : > { %v2068_v16 = vrot.slane %v2066_v14, 4  ;;  %717 = vmatprep.mubr.f32.mxu0 %v3406_v8 }
 0x208   : > { %v2069_v45 = vsel %vm559_vm2, %v2067_v15, %v2068_v16  ;;  %v639_v17 = vpop.permute.xlu0 %638 }
 0x209   : > { %v2070_v18 = vsel %vm533_vm8, %v2069_v45, %v2066_v14  ;;  %v643_v19 = vpop.permute.xlu1 %642  ;;  %v644_v23 = vsel %vm552_vm10, %v639_v17, %v641_v61  ;;  %v3274_v45 = vld [vmem:[%s4017_s7 + $0x8] sm:$0xf] }
 0x20a   : > { %v2072_v20 = vmul.f32 %v2070_v18, %v3554_v39  ;;  %v645_v21 = vsel %vm552_vm10, %v641_v61, %v643_v19 }
 0x20b   : > { %3200 = vmatprep.subr.msk.mxu0 %vm559_vm2, %v645_v21 }
 0x20c   : > { %v2160_v24 = vcombine.high %v2072_v20, %v2072_v20  ;;  %3201 = vmatpush1.msk.msra.mxu0 %vm559_vm2, %v644_v23 }
 0x20d   : > { %3202 = vmatmul.mubr.msk.f32.vlgmr.msra.gmra.mrb[2].mxu0 %vm555_vm3, %v541_v22 }
 0x20e   : > { %3264 = vmatprep.subr.msk.mxu1 %vm559_vm2, %v2160_v24  ;;  %2355 = vmatprep.mubr.f32.mxu0 %v3406_v8  ;;  %v3278_v24 = vld [vmem:[%s4017_s7 + $0xc] sm:$0xf] }
 0x20f   : > { %3265 = vmatpush1.msk.msra.mxu1 %vm559_vm2, %v2072_v20 }
 0x210   : > { %3266 = vmatmul.mubr.msk.f32.vlgmr.msra.gmra.mrb[0].mxu1 %vm555_vm3, %v3263_v25 }
 0x219   : > { %v2253_v32 = vpop.permute.xlu0 %2252 }
 0x21b   : > { %v2245_v28 = vpop.permute.xlu1 %2244 }
 0x2e0   : > { %v719_v62 = vpop.f32.mrb[2].mxu0 }
 0x2e1   : > { %v721_v26 = vpop.f32.mrb[3].mxu0 }
 0x2e3   : > { %v2234_v27 = vpop.f32.mrb[0].mxu1 }
 0x2e4   : > { %v3322_v29 = vadd.f32 %v2234_v27, %v719_v62  ;;  %v2236_v30 = vpop.f32.mrb[1].mxu1 }
 0x2e5   : > { %v3323_v31 = vadd.f32 %v2236_v30, %v721_v26 }
 0x2e6   : > { %v2247_v33 = vmul.f32 %v3322_v29, %v2245_v28 }
 0x2e7   : > { %v2248_v34 = vmul.f32 %v3323_v31, %v2245_v28 }
 0x2e8   : > { %v2255_v35 = vadd.f32 %v2253_v32, %v2247_v33 }
 0x2e9   : > { %v2256_v36 = vadd.f32 %v2253_v32, %v2248_v34 }
 0x2ea   : > { %v2257_v37 = vmax.f32 %v2255_v35, 0.0 }
 0x2eb   : > { %v2258_v38 = vmax.f32 %v2256_v36, 0.0  ;;  %v3282_v36 = vld [vmem:[%s4017_s7 + $0x10] sm:$0xf] }
 0x2ed   : > { %v2263_v40 = vcombine.low %v2257_v37, %v2258_v38 }
 0x2ef   : > { %2265 = vst [vmem:[#allocation3 + $0x4] sm:$0xff] %v2263_v40 }
 0x2f6   : > { %v2266_v42 = vld [vmem:[#allocation3] sm:$0xff]  ;;  %v3871_v46 = vld [vmem:[#allocation3 + $0x8] sm:$0xff] }
 0x2f7   : > { %2276 = vrot.lane.b32.xlu0 %v2266_v42, %s3409_s30  ;;  %v3874_v48 = vcombine.high %v2266_v42, %v2266_v42  ;;  %v2269_v49 = vmul.f32 %v3871_v46, %v3716_v47  ;;  %v2451_v51 = vmul.f32 %v2266_v42, %v3597_v58  ;;  %v2268_v52 = vmul.f32 %v2266_v42, %v3723_v50 }
 0x2f8   : > { %v2547_v58 = vmul.f32 %v3871_v46, %v3614_v0  ;;  %v2452_v47 = vmul.f32 %v3871_v46, %v3593_v57  ;;  %v2546_v50 = vmul.f32 %v2266_v42, %v3625_v3  ;;  %v2913_v57 = vcombine.high %v3871_v46, %v3871_v46  ;;  %v3104_v0 = vld [vmem:[%s4019_s9] sm:$0xf] }
 0x2f9   : > { %2278 = vrot.lane.b32.xlu1 %v3874_v48, %s3409_s30  ;;  %v2457_v53 = vcombine.high %v2451_v51, %v2451_v51  ;;  %v2364_v54 = vcombine.high %v2268_v52, %v2268_v52  ;;  %v3096_v3 = vld [vmem:[%s4018_s8] sm:$0xf] }
 0x2fa   : > { %v2552_v55 = vcombine.high %v2546_v50, %v2546_v50 }
 0x2fb   : > { %2369 = vrot.lane.b32.xlu0 %v2269_v49, %s3414_s12 }
 0x2fd   : > { %2280 = vrot.lane.b32.xlu1 %v3871_v46, %s3409_s30 }
 0x2ff   : > { %2460 = vrot.lane.b32.xlu0 %v2457_v53, %s3410_s14  ;;  %v3290_v53 = vld [vmem:[%s4017_s7 + $0x18] sm:$0xf] }
 0x301   : > { %2367 = vrot.lane.b32.xlu1 %v2364_v54, %s3414_s12 }
 0x303   : > { %2458 = vrot.lane.b32.xlu0 %v2451_v51, %s3410_s14 }
 0x305   : > { %2365 = vrot.lane.b32.xlu1 %v2268_v52, %s3414_s12  ;;  %s3305_s12 = sshll.u32 %s4024_s18, 3 }
 0x306   : > { %s403_s22 = scalar_lea.vmem %s4021_s11, %s3305_s12 }
 0x307   : > { %2557 = vrot.lane.b32.xlu0 %v2547_v58, %s3411_s15 }
 0x309   : > { %2462 = vrot.lane.b32.xlu1 %v2452_v47, %s3410_s14  ;;  %v3298_v47 = vld [vmem:[%s4017_s7 + $0x20] sm:$0xf] }
 0x30b   : > { %2723 = vrot.lane.b32.xlu0 %v2266_v42, %s3408_s25 }
 0x30d   : > { %2555 = vrot.lane.b32.xlu1 %v2552_v55, %s3411_s15 }
 0x30f   : > { %2817 = vrot.lane.b32.xlu0 %v2266_v42, %s3407_s24 }
 0x311   : > { %2553 = vrot.lane.b32.xlu1 %v2546_v50, %s3411_s15 }
 0x313   : > { %2916 = vrot.lane.b32.xlu0 %v3871_v46, %s3413_s19 }
 0x315   : > { %2725 = vrot.lane.b32.xlu1 %v3871_v46, %s3408_s25 }
 0x317   : > { %2914 = vrot.lane.b32.xlu0 %v3874_v48, %s3413_s19 }
 0x319   : > { %2819 = vrot.lane.b32.xlu1 %v3871_v46, %s3407_s24 }
 0x31b   : > { %3004 = vrot.lane.b32.xlu0 %v3871_v46, %s3412_s16 }
 0x31d   : > { %2918 = vrot.lane.b32.xlu1 %v2913_v57, %s3413_s19 }
 0x31f   : > { %3107 = vperm.xlu0 %3391, %v3104_v0  }
 0x321   : > { %3002 = vrot.lane.b32.xlu1 %v2266_v42, %s3412_s16 }
 0x325   : > { %3099 = vperm.xlu1 %3390, %v3096_v3  }
 0x369   : > { %v2277_v56 = vpop.permute.xlu0 %2276 }
 0x36b   : > { %v2279_v59 = vpop.permute.xlu1 %2278 }
 0x36c   : > { %v2282_v5 = vsel %vm735_vm1, %v2277_v56, %v2279_v59 }
 0x36d   : > { %v2370_v63 = vpop.permute.xlu0 %2369 }
 0x36f   : > { %v2281_v1 = vpop.permute.xlu1 %2280 }
 0x370   : > { %v2283_v2 = vsel %vm735_vm1, %v2279_v59, %v2281_v1 }
 0x371   : > { %v2461_v43 = vpop.permute.xlu0 %2460  ;;  %3268 = vmatprep.subr.msk.mxu0 %vm559_vm2, %v2283_v2 }
 0x372   : > { %3269 = vmatpush1.msk.msra.mxu0 %vm559_vm2, %v2282_v5 }
 0x373   : > { %3270 = vmatmul.mubr.msk.f32.vlgmr.msra.gmra.mrb[4].mxu0 %vm555_vm3, %v3267_v4  ;;  %v2368_v6 = vpop.permute.xlu1 %2367 }
 0x374   : > { %v2372_v7 = vsel %vm552_vm10, %v2368_v6, %v2370_v63  ;;  %2444 = vmatprep.mubr.f32.mxu0 %v3406_v8 }
 0x375   : > { %v2459_v9 = vpop.permute.xlu0 %2458  ;;  %3271 = vmatprep.subr.msk.mxu0 %vm559_vm2, %v2372_v7 }
 0x376   : > { %v2464_v61 = vsel %vm954_vm6, %v2459_v9, %v2461_v43 }
 0x377   : > { %v2366_v60 = vpop.permute.xlu1 %2365 }
 0x378   : > { %v2371_v10 = vsel %vm552_vm10, %v2366_v60, %v2368_v6 }
 0x379   : > { %v2558_v12 = vpop.permute.xlu0 %2557  ;;  %3272 = vmatpush1.msk.msra.mxu0 %vm559_vm2, %v2371_v10 }
 0x37b   : > { %3273 = vmatmul.mubr.msk.f32.vlgmr.msra.gmra.mrb[4].mxu0 %vm555_vm3, %v2270_v11  ;;  %v2463_v44 = vpop.permute.xlu1 %2462 }
 0x37c   : > { %v2465_v13 = vsel %vm954_vm6, %v2461_v43, %v2463_v44  ;;  %2537 = vmatprep.mubr.f32.mxu0 %v3406_v8 }
 0x37d   : > { %v2724_v14 = vpop.permute.xlu0 %2723  ;;  %3275 = vmatprep.subr.msk.mxu0 %vm559_vm2, %v2465_v13 }
 0x37e   : > { %3276 = vmatpush1.msk.msra.mxu0 %vm559_vm2, %v2464_v61  ;;  %v2727_v21 = vrot.slane %v2724_v14, 4 }
 0x37f   : > { %v2556_v15 = vpop.permute.xlu1 %2555 }
 0x380   : > { %v2560_v16 = vsel %vm1152_vm7, %v2556_v15, %v2558_v12 }
 0x381   : > { %3279 = vmatprep.subr.msk.mxu0 %vm559_vm2, %v2560_v16  ;;  %v2818_v17 = vpop.permute.xlu0 %2817 }
 0x382   : > { %v2821_v27 = vrot.slane %v2818_v17, 4 }
 0x383   : > { %3277 = vmatmul.mubr.msk.f32.vlgmr.msra.gmra.mrb[4].mxu0 %vm555_vm3, %v3274_v45  ;;  %v2554_v18 = vpop.permute.xlu1 %2553 }
 0x384   : > { %v2559_v19 = vsel %vm1152_vm7, %v2554_v18, %v2556_v15  ;;  %2632 = vmatprep.mubr.f32.mxu0 %v3406_v8 }
 0x385   : > { %3280 = vmatpush1.msk.msra.mxu0 %vm559_vm2, %v2559_v19  ;;  %v2917_v22 = vpop.permute.xlu0 %2916 }
 0x386   : > { %3283 = vmatprep.subr.msk.mxu0 %vm559_vm2, %v3871_v46 }
 0x387   : > { %v2726_v20 = vpop.permute.xlu1 %2725 }
 0x388   : > { %v2728_v23 = vrot.slane %v2726_v20, 4 }
 0x389   : > { %v2915_v31 = vpop.permute.xlu0 %2914 }
 0x38a   : > { %v2729_v25 = vsel %vm559_vm2, %v2727_v21, %v2728_v23  ;;  %v2920_v54 = vsel %vm1879_vm9, %v2915_v31, %v2917_v22 }
 0x38b   : > { %v2730_v62 = vsel %vm1133_vm5, %v2729_v25, %v2726_v20  ;;  %3281 = vmatmul.mubr.msk.f32.vlgmr.msra.gmra.mrb[4].mxu0 %vm555_vm3, %v3278_v24  ;;  %v2820_v26 = vpop.permute.xlu1 %2819 }
 0x38c   : > { %v2732_v28 = vmul.f32 %v2730_v62, %v3554_v39  ;;  %3284 = vmatpush1.msk.msra.mxu0 %vm559_vm2, %v3874_v48  ;;  %v2822_v29 = vrot.slane %v2820_v26, 4  ;;  %2714 = vmatprep.mubr.f32.mxu0 %v3406_v8 }
 0x38d   : > { %v3005_v40 = vpop.permute.xlu0 %3004 }
 0x38e   : > { %v2736_v30 = vcombine.high %v2732_v28, %v2732_v28  ;;  %v2823_v32 = vsel %vm559_vm2, %v2821_v27, %v2822_v29  ;;  %v3007_v46 = vrot.slane %v3005_v40, 4 }
 0x38f   : > { %v2824_v33 = vsel %vm935_vm4, %v2823_v32, %v2820_v26  ;;  %v2919_v34 = vpop.permute.xlu1 %2918 }
 0x390   : > { %v2826_v35 = vmul.f32 %v2824_v33, %v3561_v41  ;;  %3287 = vmatprep.subr.msk.mxu0 %vm559_vm2, %v2736_v30  ;;  %v3286_v41 = vld [vmem:[%s4017_s7 + $0x14] sm:$0xf]  ;;  %v2921_v49 = vsel %vm1879_vm9, %v2917_v22, %v2919_v34 }
 0x392   : > { %v2830_v37 = vcombine.high %v2826_v35, %v2826_v35 }
 0x393   : > { %3285 = vmatmul.mubr.msk.f32.vlgmr.msra.gmra.mrb[4].mxu0 %vm555_vm3, %v3282_v36  ;;  %v3003_v38 = vpop.permute.xlu1 %3002 }
 0x394   : > { %3288 = vmatpush1.msk.msra.mxu0 %vm559_vm2, %v2732_v28  ;;  %2808 = vmatprep.mubr.f32.mxu0 %v3406_v8  ;;  %v3006_v42 = vrot.slane %v3003_v38, 4 }
 0x395   : > { %3291 = vmatprep.subr.msk.mxu0 %vm559_vm2, %v2830_v37 }
 0x396   : > { %v3008_v48 = vsel %vm559_vm2, %v3006_v42, %v3007_v46 }
 0x397   : > { %v3009_v51 = vsel %vm533_vm8, %v3008_v48, %v3005_v40 }
 0x398   : > { %v3011_v52 = vmul.f32 %v3009_v51, %v3554_v39  ;;  %v3294_v39 = vld [vmem:[%s4017_s7 + $0x1c] sm:$0xf] }
 0x39a   : > { %v3015_v58 = vcombine.high %v3011_v52, %v3011_v52 }
 0x39b   : > { %3289 = vmatmul.mubr.msk.f32.vlgmr.msra.gmra.mrb[4].mxu0 %vm555_vm3, %v3286_v41 }
 0x39c   : > { %3292 = vmatpush1.msk.msra.mxu0 %vm559_vm2, %v2826_v35  ;;  %2902 = vmatprep.mubr.f32.mxu0 %v3406_v8 }
 0x39d   : > { %3295 = vmatprep.subr.msk.mxu0 %vm559_vm2, %v2921_v49 }
 0x39e   : > { %v3108_v3 = vpop.permute.xlu0 %3107 }
 0x3a3   : > { %3293 = vmatmul.mubr.msk.f32.vlgmr.msra.gmra.mrb[4].mxu0 %vm555_vm3, %v3290_v53 }
 0x3a4   : > { %3296 = vmatpush1.msk.msra.mxu0 %vm559_vm2, %v2920_v54  ;;  %2993 = vmatprep.mubr.f32.mxu0 %v3406_v8  ;;  %v3100_v50 = vpop.permute.xlu1 %3099 }
 0x3a5   : > { %3299 = vmatprep.subr.msk.mxu0 %vm559_vm2, %v3015_v58 }
 0x3ab   : > { %3297 = vmatmul.mubr.msk.f32.vlgmr.msra.gmra.mrb[4].mxu0 %vm555_vm3, %v3294_v39 }
 0x3ac   : > { %3300 = vmatpush1.msk.msra.mxu0 %vm559_vm2, %v3011_v52  ;;  %3087 = vmatprep.mubr.f32.mxu0 %v3406_v8 }
 0x3b3   : > { %3301 = vmatmul.mubr.msk.f32.vlgmr.msra.gmra.mrb[4].mxu0 %vm555_vm3, %v3298_v47 }
 0x486   : > { %v3089_v55 = vpop.f32.mrb[4].mxu0 }
 0x487   : > { %v3102_v57 = vmul.f32 %v3100_v50, %v3089_v55  ;;  %v3091_v0 = vpop.f32.mrb[5].mxu0 }
 0x488   : > { %v3103_v56 = vmul.f32 %v3100_v50, %v3091_v0 }
 0x489   : > { %v3110_v59 = vadd.f32 %v3108_v3, %v3102_v57 }
 0x48a   : > { %v3111_v63 = vadd.f32 %v3108_v3, %v3103_v56 }
 0x48b   : > { %v3112_v1 = vmax.f32 %v3110_v59, 0.0 }
 0x48c   : > { %v3113_v2 = vmax.f32 %v3111_v63, 0.0 }
 0x48e   : > { %v3116_v8 = vcombine.low %v3112_v1, %v3113_v2 }
 0x490   : > { %3118 = vst [vmem:[%s403_s22] sm:$0xff] %v3116_v8 }
 0x491 PF: > { %s21_s17 = sadd.s32 1, %s3404_s17  }
 0x492   : > { %p18_p4 = scmp.ge.s32.totalorder %s21_s17, 4  }
 0x494   :  { %20 = sbr.rel (!%p18_p4) target bundleno = 1 (0x1), region = 121 }

</bundles_post_ra>
